<compile_context>
chip_gen: v6e
topology: v6e:2x2x1
jax: 0.10.0
libtpu: 0.0.40
codegen_flags: <defaults>
</compile_context>

<pallas_src>
import functools
import math

import jax
import jax.numpy as jnp
from jax.experimental import pallas as pl
from jax.experimental.pallas import tpu as pltpu

_D_IN = 28 * 28          # 784 (full last dim of the flattened input)
_D_H = 512
_NUM_CLASSES = 10
_D_OUT_PAD = 128         # lane-dense output / third-matmul N


def _round_up(x, m):
    return (x + m - 1) // m * m


def _mlp_kernel(x_ref, w1_ref, b1_ref, w2_ref, b2_ref, w3_ref, b3_ref, o_ref):
    # x arrives as the raw f32 (tile, 784) activation tile; the bf16 cast is
    # fused here so the wrapper never runs a separate pad/cast pass over the
    # activations.  The VPU cast overlaps with MXU work (different slots).
    x = x_ref[...].astype(jnp.bfloat16)

    # fc1 + ReLU  (bf16 MXU operands, f32 accumulate; K=784 padded by Mosaic)
    h = jnp.dot(x, w1_ref[...], preferred_element_type=jnp.float32)
    h = jnp.maximum(h + b1_ref[...], 0.0)
    # fc2 + ReLU
    h = jnp.dot(h.astype(jnp.bfloat16), w2_ref[...],
                preferred_element_type=jnp.float32)
    h = jnp.maximum(h + b2_ref[...], 0.0)
    # fc3 + ReLU  (the PyTorch module applies ReLU before softmax too)
    h = jnp.dot(h.astype(jnp.bfloat16), w3_ref[...],
                preferred_element_type=jnp.float32)
    h = jnp.maximum(h + b3_ref[...], 0.0)
    # Mask the zero-padded class lanes (>= 10) to -inf BEFORE the softmax so
    # they contribute exactly 0 to the denominator.
    lane = jax.lax.broadcasted_iota(jnp.int32, h.shape, 1)
    h = jnp.where(lane < _NUM_CLASSES, h, -jnp.inf)
    # Stable softmax over the class axis; exact reciprocal so rows sum to 1.
    m = jnp.max(h, axis=-1, keepdims=True)
    e = jnp.exp(h - m)
    denom = jnp.sum(e, axis=-1, keepdims=True)
    o_ref[...] = (e * pl.reciprocal(denom, approx=False)).astype(o_ref.dtype)


@functools.partial(jax.jit, static_argnames=("batch_tile",))
def net_forward(x_nchw, params, *, batch_tile=512):
    """Forward pass of Net. x_nchw: (N, 1, 28, 28) float32 -> (N, 10) float32."""
    w1, b1, w2, b2, w3, b3 = params
    n = x_nchw.shape[0]

    # nn.Flatten -> (N, 784).  No feature-dim pad and no dtype cast here: the
    # bf16 cast is fused into the kernel and 784 (full last dim) is a legal
    # BlockSpec lane extent, so the only possible wrapper-side copy is the
    # (usually empty) batch pad below.
    x = x_nchw.reshape(n, -1)
    assert x.shape[1] == _D_IN

    # Batch tile: 512 rows for realistic batches; tiny batches shrink to a
    # 16-row-aligned tile (bf16 sublane packing).  Any N > batch_tile yields
    # >= 2 grid steps so the "parallel" axis can shard across v7x's 2 TCs.
    tile = min(batch_tile, _round_up(n, 16))
    n_pad = _round_up(n, tile)
    if n_pad != n:
        x = jnp.pad(x, ((0, n_pad - n), (0, 0)))

    # Weights stay whole in VMEM.  w3/b3 are zero-padded to 128 output lanes
    # so the final matmul and the output store are lane-dense; the padded
    # lanes are masked to -inf before the in-kernel softmax (numerically
    # identical to the 10-class softmax).
    w1b = w1.astype(jnp.bfloat16)
    w2b = w2.astype(jnp.bfloat16)
    w3b = jnp.pad(w3, ((0, 0), (0, _D_OUT_PAD - _NUM_CLASSES))).astype(jnp.bfloat16)
    b3p = jnp.pad(b3, ((0, 0), (0, _D_OUT_PAD - _NUM_CLASSES)))
    # biases stay f32 (added to the f32 accumulator)

    grid = (n_pad // tile,)
    # Grid-invariant weight/bias blocks (same block index every step).
    weight_spec = lambda shape: pl.BlockSpec(shape, lambda i: (0, 0))

    out = pl.pallas_call(
        _mlp_kernel,
        out_shape=jax.ShapeDtypeStruct((n_pad, _D_OUT_PAD), jnp.float32),
        grid_spec=pltpu.PrefetchScalarGridSpec(
            num_scalar_prefetch=0,
            grid=grid,
            in_specs=[
                pl.BlockSpec((tile, _D_IN), lambda i: (i, 0)),  # x tile (f32)
                weight_spec((_D_IN, _D_H)),        # w1 (stored as (in, out))
                weight_spec((1, _D_H)),            # b1
                weight_spec((_D_H, _D_H)),         # w2
                weight_spec((1, _D_H)),            # b2
                weight_spec((_D_H, _D_OUT_PAD)),   # w3 (padded to 128 cols)
                weight_spec((1, _D_OUT_PAD)),      # b3 (padded to 128 cols)
            ],
            out_specs=pl.BlockSpec((tile, _D_OUT_PAD), lambda i: (i, 0)),
        ),
        compiler_params=pltpu.CompilerParams(
            dimension_semantics=("parallel",),
        ),
    )(x, w1b, b1, w2b, b2, w3b, b3p)

    # Drop batch padding and the padded class lanes.
    return out[:n, :_NUM_CLASSES]


def init_params(key):
    """Deterministic init mimicking PyTorch nn.Linear defaults
    (uniform(-1/sqrt(fan_in), 1/sqrt(fan_in))). Weights stored as (in, out)."""
    def linear(key, fan_in, fan_out):
        kw, kb = jax.random.split(key)
        bound = 1.0 / math.sqrt(fan_in)
        w = jax.random.uniform(
            kw, (fan_in, fan_out), jnp.float32, minval=-bound, maxval=bound
        )
        b = jax.random.uniform(
            kb, (1, fan_out), jnp.float32, minval=-bound, maxval=bound
        )
        return w, b

    k1, k2, k3 = jax.random.split(key, 3)
    w1, b1 = linear(k1, _D_IN, _D_H)
    w2, b2 = linear(k2, _D_H, _D_H)
    w3, b3 = linear(k3, _D_H, _NUM_CLASSES)
    return (w1, b1, w2, b2, w3, b3)


def net_forward_ref(x_nchw, params):
    """Pure-JAX f32 reference for correctness checking."""
    w1, b1, w2, b2, w3, b3 = params
    x = x_nchw.reshape(x_nchw.shape[0], -1)
    h = jax.nn.relu(x @ w1 + b1)
    h = jax.nn.relu(h @ w2 + b2)
    h = jax.nn.relu(h @ w3 + b3)
    return jax.nn.softmax(h, axis=1)


if __name__ == "__main__":
    key = jax.random.PRNGKey(0)
    k_param, k_x = jax.random.split(key)

    params = init_params(k_param)
    # MNIST-like input: batch=8, NCHW (8, 1, 28, 28)
    x = jax.random.normal(k_x, (8, 1, 28, 28), dtype=jnp.float32)

    out = net_forward(x, params)
    out = jax.block_until_ready(out)

    ref = net_forward_ref(x, params)
    assert out.shape == (8, _NUM_CLASSES), out.shape
    # bf16 matmul operands -> compare against the f32 reference with a
    # correspondingly loose tolerance (softmax outputs are in [0, 1]).
    assert jnp.allclose(out, ref, atol=2e-2, rtol=2e-2), "mismatch vs reference"
    assert jnp.allclose(jnp.sum(out, axis=1), 1.0, atol=1e-3), "rows must sum to 1"

    print("KERNEL_OK")
</pallas_src>

<mosaic_0001>
module attributes {stable_mosaic.version = 11 : i64} {
  func.func @_mlp_kernel(%arg0: i32, %arg1: memref<16x784xf32, #tpu.memory_space<vmem>>, %arg2: memref<784x512xbf16, #tpu.memory_space<vmem>>, %arg3: memref<1x512xf32, #tpu.memory_space<vmem>>, %arg4: memref<512x512xbf16, #tpu.memory_space<vmem>>, %arg5: memref<1x512xf32, #tpu.memory_space<vmem>>, %arg6: memref<512x128xbf16, #tpu.memory_space<vmem>>, %arg7: memref<1x128xf32, #tpu.memory_space<vmem>>, %arg8: memref<16x128xf32, #tpu.memory_space<vmem>>) attributes {dimension_semantics = [#tpu.dimension_semantics<parallel>], iteration_bounds = array<i64: 1>, scalar_prefetch = 0 : i64, scratch_operands = 0 : i64, tpu.core_type = #tpu.core_type<tc>, window_params = [{transform_indices = @transform_0, window_bounds = array<i64: 16, 784>}, {pipeline_mode = #tpu.pipeline_mode<synchronous>, transform_indices = @transform_1, window_bounds = array<i64: 784, 512>}, {pipeline_mode = #tpu.pipeline_mode<synchronous>, transform_indices = @transform_2, window_bounds = array<i64: 1, 512>}, {pipeline_mode = #tpu.pipeline_mode<synchronous>, transform_indices = @transform_3, window_bounds = array<i64: 512, 512>}, {pipeline_mode = #tpu.pipeline_mode<synchronous>, transform_indices = @transform_4, window_bounds = array<i64: 1, 512>}, {pipeline_mode = #tpu.pipeline_mode<synchronous>, transform_indices = @transform_5, window_bounds = array<i64: 512, 128>}, {pipeline_mode = #tpu.pipeline_mode<synchronous>, transform_indices = @transform_6, window_bounds = array<i64: 1, 128>}, {transform_indices = @transform_7, window_bounds = array<i64: 16, 128>}]} {
    %c0 = arith.constant 0 : index
    %c0_0 = arith.constant 0 : index
    %0 = vector.load %arg1[%c0, %c0_0] : memref<16x784xf32, #tpu.memory_space<vmem>>, vector<16x784xf32>
    %1 = arith.truncf %0 : vector<16x784xf32> to vector<16x784xbf16>
    %c0_1 = arith.constant 0 : index
    %c0_2 = arith.constant 0 : index
    %2 = vector.load %arg2[%c0_1, %c0_2] : memref<784x512xbf16, #tpu.memory_space<vmem>>, vector<784x512xbf16>
    %cst = arith.constant dense<0.000000e+00> : vector<16x512xf32>
    %3 = tpu.matmul %1, %2, %cst {dimension_numbers = #tpu.dot_dimension_numbers<[1], [0], [0], [1], [0, 0, 1, 1], [], []>} : vector<16x784xbf16>, vector<784x512xbf16>, vector<16x512xf32> -> vector<16x512xf32>
    %c0_3 = arith.constant 0 : index
    %c0_4 = arith.constant 0 : index
    %4 = vector.load %arg3[%c0_3, %c0_4] : memref<1x512xf32, #tpu.memory_space<vmem>>, vector<1x512xf32>
    %5 = vector.broadcast %4 : vector<1x512xf32> to vector<16x512xf32>
    %6 = arith.addf %3, %5 : vector<16x512xf32>
    %cst_5 = arith.constant 0.000000e+00 : f32
    %7 = vector.broadcast %cst_5 : f32 to vector<16x512xf32>
    %8 = arith.maximumf %6, %7 : vector<16x512xf32>
    %9 = arith.truncf %8 : vector<16x512xf32> to vector<16x512xbf16>
    %c0_6 = arith.constant 0 : index
    %c0_7 = arith.constant 0 : index
    %10 = vector.load %arg4[%c0_6, %c0_7] : memref<512x512xbf16, #tpu.memory_space<vmem>>, vector<512x512xbf16>
    %cst_8 = arith.constant dense<0.000000e+00> : vector<16x512xf32>
    %11 = tpu.matmul %9, %10, %cst_8 {dimension_numbers = #tpu.dot_dimension_numbers<[1], [0], [0], [1], [0, 0, 1, 1], [], []>} : vector<16x512xbf16>, vector<512x512xbf16>, vector<16x512xf32> -> vector<16x512xf32>
    %c0_9 = arith.constant 0 : index
    %c0_10 = arith.constant 0 : index
    %12 = vector.load %arg5[%c0_9, %c0_10] : memref<1x512xf32, #tpu.memory_space<vmem>>, vector<1x512xf32>
    %13 = vector.broadcast %12 : vector<1x512xf32> to vector<16x512xf32>
    %14 = arith.addf %11, %13 : vector<16x512xf32>
    %cst_11 = arith.constant 0.000000e+00 : f32
    %15 = vector.broadcast %cst_11 : f32 to vector<16x512xf32>
    %16 = arith.maximumf %14, %15 : vector<16x512xf32>
    %17 = arith.truncf %16 : vector<16x512xf32> to vector<16x512xbf16>
    %c0_12 = arith.constant 0 : index
    %c0_13 = arith.constant 0 : index
    %18 = vector.load %arg6[%c0_12, %c0_13] : memref<512x128xbf16, #tpu.memory_space<vmem>>, vector<512x128xbf16>
    %cst_14 = arith.constant dense<0.000000e+00> : vector<16x128xf32>
    %19 = tpu.matmul %17, %18, %cst_14 {dimension_numbers = #tpu.dot_dimension_numbers<[1], [0], [0], [1], [0, 0, 1, 1], [], []>} : vector<16x512xbf16>, vector<512x128xbf16>, vector<16x128xf32> -> vector<16x128xf32>
    %c0_15 = arith.constant 0 : index
    %c0_16 = arith.constant 0 : index
    %20 = vector.load %arg7[%c0_15, %c0_16] : memref<1x128xf32, #tpu.memory_space<vmem>>, vector<1x128xf32>
    %21 = vector.broadcast %20 : vector<1x128xf32> to vector<16x128xf32>
    %22 = arith.addf %19, %21 : vector<16x128xf32>
    %cst_17 = arith.constant 0.000000e+00 : f32
    %23 = vector.broadcast %cst_17 : f32 to vector<16x128xf32>
    %24 = arith.maximumf %22, %23 : vector<16x128xf32>
    %25 = tpu.iota {dimensions = array<i32: 1>} : vector<16x128xi32>
    %c10_i32 = arith.constant 10 : i32
    %26 = vector.broadcast %c10_i32 : i32 to vector<16x128xi32>
    %27 = arith.cmpi slt, %25, %26 : vector<16x128xi32>
    %cst_18 = arith.constant 0xFF800000 : f32
    %28 = vector.broadcast %cst_18 : f32 to vector<16x128xf32>
    %29 = arith.select %27, %24, %28 : vector<16x128xi1>, vector<16x128xf32>
    %cst_19 = arith.constant dense<0xFF800000> : vector<16xf32>
    %30 = vector.multi_reduction <maximumf>, %29, %cst_19 [1] : vector<16x128xf32> to vector<16xf32>
    %31 = vector.shape_cast %30 : vector<16xf32> to vector<16x1xf32>
    %32 = vector.broadcast %31 : vector<16x1xf32> to vector<16x128xf32>
    %33 = arith.subf %29, %32 : vector<16x128xf32>
    %34 = math.exp %33 : vector<16x128xf32>
    %cst_20 = arith.constant dense<0.000000e+00> : vector<16xf32>
    %35 = vector.multi_reduction <add>, %34, %cst_20 [1] : vector<16x128xf32> to vector<16xf32>
    %36 = vector.shape_cast %35 : vector<16xf32> to vector<16x1xf32>
    %37 = tpu.reciprocal %36 : vector<16x1xf32> -> vector<16x1xf32>
    %38 = vector.broadcast %37 : vector<16x1xf32> to vector<16x128xf32>
    %39 = arith.mulf %34, %38 : vector<16x128xf32>
    %c0_21 = arith.constant 0 : index
    %c0_22 = arith.constant 0 : index
    %40 = vector.load %arg8[%c0_21, %c0_22] : memref<16x128xf32, #tpu.memory_space<vmem>>, vector<16x128xf32>
    tpu.vector_store %arg8[%c0_21, %c0_22], %39 {strides = array<i32>} : memref<16x128xf32, #tpu.memory_space<vmem>>, vector<16x128xf32>,
    return
  }
  func.func @transform_0(%arg0: i32) -> (i32, i32) {
    %c0_i32 = arith.constant 0 : i32
    %c0_i32_0 = arith.constant 0 : i32
    return %arg0, %c0_i32 : i32, i32
  }
  func.func @transform_1(%arg0: i32) -> (i32, i32) {
    %c0_i32 = arith.constant 0 : i32
    %c0_i32_0 = arith.constant 0 : i32
    %c0_i32_1 = arith.constant 0 : i32
    return %c0_i32, %c0_i32_0 : i32, i32
  }
  func.func @transform_2(%arg0: i32) -> (i32, i32) {
    %c0_i32 = arith.constant 0 : i32
    %c0_i32_0 = arith.constant 0 : i32
    %c0_i32_1 = arith.constant 0 : i32
    return %c0_i32, %c0_i32_0 : i32, i32
  }
  func.func @transform_3(%arg0: i32) -> (i32, i32) {
    %c0_i32 = arith.constant 0 : i32
    %c0_i32_0 = arith.constant 0 : i32
    %c0_i32_1 = arith.constant 0 : i32
    return %c0_i32, %c0_i32_0 : i32, i32
  }
  func.func @transform_4(%arg0: i32) -> (i32, i32) {
    %c0_i32 = arith.constant 0 : i32
    %c0_i32_0 = arith.constant 0 : i32
    %c0_i32_1 = arith.constant 0 : i32
    return %c0_i32, %c0_i32_0 : i32, i32
  }
  func.func @transform_5(%arg0: i32) -> (i32, i32) {
    %c0_i32 = arith.constant 0 : i32
    %c0_i32_0 = arith.constant 0 : i32
    %c0_i32_1 = arith.constant 0 : i32
    return %c0_i32, %c0_i32_0 : i32, i32
  }
  func.func @transform_6(%arg0: i32) -> (i32, i32) {
    %c0_i32 = arith.constant 0 : i32
    %c0_i32_0 = arith.constant 0 : i32
    %c0_i32_1 = arith.constant 0 : i32
    return %c0_i32, %c0_i32_0 : i32, i32
  }
  func.func @transform_7(%arg0: i32) -> (i32, i32) {
    %c0_i32 = arith.constant 0 : i32
    %c0_i32_0 = arith.constant 0 : i32
    return %arg0, %c0_i32 : i32, i32
  }
}

</mosaic_0001>

<bundles_post_ra>
// kernel: net_forward.1
= control target key start
LH: loop header
LB: loop body
LE: loop exit
PB: predicated region body
PF: predicated region fallthrough
CT: control target
= control target key end

     0   :  { %vm1246_vm0 = vcmask 130048   ;;  %s5122_s1 = inlined_call_operand.vmem [shape: bf16[784,512], index: 1, kind: input, shape index: {}]   ;;  %s5123_s0 = inlined_call_operand.vmem [shape: f32[16,784], index: 0, kind: input, shape index: {}]   ;;  %s5124_s3 = inlined_call_operand.vmem [shape: bf16[512,512], index: 3, kind: input, shape index: {}]   ;;  %s5125_s2 = inlined_call_operand.vmem [shape: f32[1,512], index: 2, kind: input, shape index: {}]   ;;  %s5126_s5 = inlined_call_operand.vmem [shape: bf16[512,128], index: 5, kind: input, shape index: {}]   ;;  %s5127_s4 = inlined_call_operand.vmem [shape: f32[1,512], index: 4, kind: input, shape index: {}]   ;;  %s5128_s6 = inlined_call_operand.vmem [shape: f32[1,128], index: 6, kind: input, shape index: {}]   ;;  %s5129_s7 = inlined_call_operand.vmem [shape: f32[16,128], index: 7, kind: output, shape index: {}]  }
   0x1   :  { %v3360_v0 = vld [vmem:[%s5122_s1 + $0xe4] ss:$16 sps:$4 sm:$0xff]   ;;  %v3364_v2 = vld [vmem:[%s5122_s1 + $0xe0] ss:$16 sps:$4 sm:$0xff]   ;;  %v28_v46 = vld [vmem:[%s5123_s0 + $0x8] sm:$0xff] }
   0x2   :  { %v3362_v1 = vld [vmem:[%s5122_s1 + $0x2e4] ss:$16 sps:$4 sm:$0xff]   ;;  %1250 = vmatprep.subr.bf16.mxu0 %v3360_v0  ;;  %v3365_v3 = vld [vmem:[%s5122_s1 + $0x2e0] ss:$16 sps:$4 sm:$0xff]   ;;  %v30_v48 = vld [vmem:[%s5123_s0 + $0x18] sm:$0xff] }
   0x3   :  { %1293 = vmatprep.subr.bf16.mxu1 %v3362_v1  ;;  %v3366_v4 = vld [vmem:[%s5122_s1 + $0xc4] ss:$16 sps:$4 sm:$0xff]   ;;  %1251 = vmatpush1.bf16.msra.mxu0 %v3364_v2  ;;  %v3370_v6 = vld [vmem:[%s5122_s1 + $0xc0] ss:$16 sps:$4 sm:$0xff]  }
   0x4   :  { %1294 = vmatpush1.bf16.msra.mxu1 %v3365_v3  ;;  %v3368_v5 = vld [vmem:[%s5122_s1 + $0x2c4] ss:$16 sps:$4 sm:$0xff]   ;;  %1252 = vmatprep.subr.bf16.mxu0 %v3366_v4  ;;  %v3371_v7 = vld [vmem:[%s5122_s1 + $0x2c0] ss:$16 sps:$4 sm:$0xff]  }
   0x5   :  { %1295 = vmatprep.subr.bf16.mxu1 %v3368_v5  ;;  %v3372_v8 = vld [vmem:[%s5122_s1 + $0xa4] ss:$16 sps:$4 sm:$0xff]   ;;  %v3376_v10 = vld [vmem:[%s5122_s1 + $0xa0] ss:$16 sps:$4 sm:$0xff]  }
   0x6   :  { %v3374_v9 = vld [vmem:[%s5122_s1 + $0x2a4] ss:$16 sps:$4 sm:$0xff]   ;;  %v3377_v11 = vld [vmem:[%s5122_s1 + $0x2a0] ss:$16 sps:$4 sm:$0xff]  }
   0x7   :  { %1253 = vmatpush1.bf16.msra.mxu0 %v3370_v6  ;;  %v3378_v12 = vld [vmem:[%s5122_s1 + $0x84] ss:$16 sps:$4 sm:$0xff]   ;;  %v3382_v14 = vld [vmem:[%s5122_s1 + $0x80] ss:$16 sps:$4 sm:$0xff]  }
   0x8   :  { %1296 = vmatpush1.bf16.msra.mxu1 %v3371_v7  ;;  %1254 = vmatprep.subr.bf16.mxu0 %v3372_v8  ;;  %v3380_v13 = vld [vmem:[%s5122_s1 + $0x284] ss:$16 sps:$4 sm:$0xff]   ;;  %v3383_v15 = vld [vmem:[%s5122_s1 + $0x280] ss:$16 sps:$4 sm:$0xff]   ;;  %v34_v7 = vld [vmem:[%s5123_s0 + $0x38] sm:$0xff] }
   0x9   :  { %1297 = vmatprep.subr.bf16.mxu1 %v3374_v9  ;;  %v3384_v16 = vld [vmem:[%s5122_s1 + $0x64] ss:$16 sps:$4 sm:$0xff]   ;;  %v3388_v18 = vld [vmem:[%s5122_s1 + $0x60] ss:$16 sps:$4 sm:$0xff]   ;;  %v36_v9 = vld [vmem:[%s5123_s0 + $0x48] sm:$0xff] }
   0xa   :  { %v3386_v17 = vld [vmem:[%s5122_s1 + $0x264] ss:$16 sps:$4 sm:$0xff]   ;;  %v3389_v19 = vld [vmem:[%s5122_s1 + $0x260] ss:$16 sps:$4 sm:$0xff]  }
   0xb   :  { %1255 = vmatpush1.bf16.msra.mxu0 %v3376_v10  ;;  %v3390_v20 = vld [vmem:[%s5122_s1 + $0x44] ss:$16 sps:$4 sm:$0xff]   ;;  %v3394_v22 = vld [vmem:[%s5122_s1 + $0x40] ss:$16 sps:$4 sm:$0xff]  }
   0xc   :  { %1298 = vmatpush1.bf16.msra.mxu1 %v3377_v11  ;;  %1256 = vmatprep.subr.bf16.mxu0 %v3378_v12  ;;  %v3392_v21 = vld [vmem:[%s5122_s1 + $0x244] ss:$16 sps:$4 sm:$0xff]   ;;  %v3395_v23 = vld [vmem:[%s5122_s1 + $0x240] ss:$16 sps:$4 sm:$0xff]  }
   0xd   :  { %1299 = vmatprep.subr.bf16.mxu1 %v3380_v13  ;;  %v3396_v24 = vld [vmem:[%s5122_s1 + $0x24] ss:$16 sps:$4 sm:$0xff]   ;;  %v3400_v26 = vld [vmem:[%s5122_s1 + $0x20] ss:$16 sps:$4 sm:$0xff]  }
   0xe   :  { %v3398_v25 = vld [vmem:[%s5122_s1 + $0x224] ss:$16 sps:$4 sm:$0xff]   ;;  %v3401_v27 = vld [vmem:[%s5122_s1 + $0x220] ss:$16 sps:$4 sm:$0xff]  }
   0xf   :  { %1257 = vmatpush1.bf16.msra.mxu0 %v3382_v14  ;;  %v3402_v28 = vld [vmem:[%s5122_s1 + $0x4] ss:$16 sps:$4 sm:$0xff]   ;;  %v3406_v30 = vld [vmem:[%s5122_s1] ss:$16 sps:$4 sm:$0xff]  }
  0x10   :  { %1300 = vmatpush1.bf16.msra.mxu1 %v3383_v15  ;;  %1258 = vmatprep.subr.bf16.mxu0 %v3384_v16  ;;  %v3404_v29 = vld [vmem:[%s5122_s1 + $0x204] ss:$16 sps:$4 sm:$0xff]   ;;  %v3407_v31 = vld [vmem:[%s5122_s1 + $0x200] ss:$16 sps:$4 sm:$0xff]  }
  0x11   :  { %1301 = vmatprep.subr.bf16.mxu1 %v3386_v17  ;;  %v3408_v32 = vld [vmem:[%s5122_s1 + $0x1e4] ss:$16 sps:$4 sm:$0xff]   ;;  %v3412_v34 = vld [vmem:[%s5122_s1 + $0x1e0] ss:$16 sps:$4 sm:$0xff]   ;;  %v3467_v17 = vld [vmem:[%s5122_s1 + $0xec] ss:$16 sps:$4 sm:$0xff]  }
  0x12   :  { %v3410_v33 = vld [vmem:[%s5122_s1 + $0x3e4] ss:$16 sps:$4 sm:$0xff]   ;;  %v3413_v35 = vld [vmem:[%s5122_s1 + $0x3e0] ss:$16 sps:$4 sm:$0xff]  }
  0x13   :  { %1259 = vmatpush1.bf16.msra.mxu0 %v3388_v18  ;;  %v3414_v36 = vld [vmem:[%s5122_s1 + $0x1c4] ss:$16 sps:$4 sm:$0xff]   ;;  %v3418_v38 = vld [vmem:[%s5122_s1 + $0x1c0] ss:$16 sps:$4 sm:$0xff]  }
  0x14   :  { %1302 = vmatpush1.bf16.msra.mxu1 %v3389_v19  ;;  %1260 = vmatprep.subr.bf16.mxu0 %v3390_v20  ;;  %v3416_v37 = vld [vmem:[%s5122_s1 + $0x3c4] ss:$16 sps:$4 sm:$0xff]   ;;  %v3419_v39 = vld [vmem:[%s5122_s1 + $0x3c0] ss:$16 sps:$4 sm:$0xff]   ;;  %v40_v20 = vld [vmem:[%s5123_s0 + $0x68] sm:$0xff] }
  0x15   :  { %1303 = vmatprep.subr.bf16.mxu1 %v3392_v21  ;;  %v3420_v40 = vld [vmem:[%s5122_s1 + $0x1a4] ss:$16 sps:$4 sm:$0xff]   ;;  %v3424_v42 = vld [vmem:[%s5122_s1 + $0x1a0] ss:$16 sps:$4 sm:$0xff]   ;;  %v3886_v21 = vmov 0  }
  0x16   :  { %v3422_v41 = vld [vmem:[%s5122_s1 + $0x3a4] ss:$16 sps:$4 sm:$0xff]   ;;  %v3425_v43 = vld [vmem:[%s5122_s1 + $0x3a0] ss:$16 sps:$4 sm:$0xff]  }
  0x17   :  { %1261 = vmatpush1.bf16.msra.mxu0 %v3394_v22  ;;  %v3426_v44 = vld [vmem:[%s5122_s1 + $0x184] ss:$16 sps:$4 sm:$0xff]   ;;  %v3430_v50 = vld [vmem:[%s5122_s1 + $0x180] ss:$16 sps:$4 sm:$0xff]  }
  0x18   :  { %1304 = vmatpush1.bf16.msra.mxu1 %v3395_v23  ;;  %1262 = vmatprep.subr.bf16.mxu0 %v3396_v24  ;;  %v3428_v45 = vld [vmem:[%s5122_s1 + $0x384] ss:$16 sps:$4 sm:$0xff]   ;;  %v3431_v51 = vld [vmem:[%s5122_s1 + $0x380] ss:$16 sps:$4 sm:$0xff]   ;;  %v3465_v24 = vld [vmem:[%s5122_s1 + $0xe8] ss:$16 sps:$4 sm:$0xff]  }
  0x19   :  { %1305 = vmatprep.subr.bf16.mxu1 %v3398_v25  ;;  %v35_v47 = vld [vmem:[%s5123_s0 + $0x40] sm:$0xff]  ;;  %v37_v49 = vld [vmem:[%s5123_s0 + $0x50] sm:$0xff] }
  0x1a   :  { %v3432_v52 = vld [vmem:[%s5122_s1 + $0x164] ss:$16 sps:$4 sm:$0xff]   ;;  %v4086_v53 = vpack.c.bf16 %v35_v47, %v28_v46  ;;  %v4088_v54 = vpack.c.bf16 %v37_v49, %v30_v48  ;;  %v3436_v56 = vld [vmem:[%s5122_s1 + $0x160] ss:$16 sps:$4 sm:$0xff]   ;;  %v3495_v47 = vld [vmem:[%s5122_s1 + $0x48] ss:$16 sps:$4 sm:$0xff]  }
  0x1b   :  { %1263 = vmatpush1.bf16.msra.mxu0 %v3400_v26  ;;  %v3434_v55 = vld [vmem:[%s5122_s1 + $0x364] ss:$16 sps:$4 sm:$0xff]   ;;  %v3437_v57 = vld [vmem:[%s5122_s1 + $0x360] ss:$16 sps:$4 sm:$0xff]   ;;  %v3473_v26 = vld [vmem:[%s5122_s1 + $0xcc] ss:$16 sps:$4 sm:$0xff]  }
  0x1c   :  { %1306 = vmatpush1.bf16.msra.mxu1 %v3401_v27  ;;  %1264 = vmatprep.subr.bf16.mxu0 %v3402_v28  ;;  %v3438_v58 = vld [vmem:[%s5122_s1 + $0x144] ss:$16 sps:$4 sm:$0xff]   ;;  %v3442_v60 = vld [vmem:[%s5122_s1 + $0x140] ss:$16 sps:$4 sm:$0xff]   ;;  %v3471_v28 = vld [vmem:[%s5122_s1 + $0xc8] ss:$16 sps:$4 sm:$0xff]  }
  0x1d   :  { %1307 = vmatprep.subr.bf16.mxu1 %v3404_v29  ;;  %1282 = vmatprep.mubr.bf16.mxu0 %v4086_v53  ;;  %v3440_v59 = vld [vmem:[%s5122_s1 + $0x344] ss:$16 sps:$4 sm:$0xff]   ;;  %v3443_v61 = vld [vmem:[%s5122_s1 + $0x340] ss:$16 sps:$4 sm:$0xff]   ;;  %v3503_v49 = vld [vmem:[%s5122_s1 + $0x2c] ss:$16 sps:$4 sm:$0xff]  }
  0x1e   :  { %1325 = vmatprep.mubr.bf16.mxu1 %v4088_v54  ;;  %v3444_v62 = vld [vmem:[%s5122_s1 + $0x124] ss:$16 sps:$4 sm:$0xff]   ;;  %v3448_v0 = vld [vmem:[%s5122_s1 + $0x120] ss:$16 sps:$4 sm:$0xff]  }
  0x1f   :  { %1265 = vmatpush1.bf16.msra.mxu0 %v3406_v30  ;;  %v3446_v63 = vld [vmem:[%s5122_s1 + $0x324] ss:$16 sps:$4 sm:$0xff]   ;;  %v3449_v1 = vld [vmem:[%s5122_s1 + $0x320] ss:$16 sps:$4 sm:$0xff]   ;;  %v3479_v30 = vld [vmem:[%s5122_s1 + $0xac] ss:$16 sps:$4 sm:$0xff]  }
  0x20   :  { %1308 = vmatpush1.bf16.msra.mxu1 %v3407_v31  ;;  %1266 = vmatprep.subr.bf16.mxu0 %v3408_v32  ;;  %v3450_v2 = vld [vmem:[%s5122_s1 + $0x104] ss:$16 sps:$4 sm:$0xff]   ;;  %v3454_v4 = vld [vmem:[%s5122_s1 + $0x100] ss:$16 sps:$4 sm:$0xff]   ;;  %v3477_v32 = vld [vmem:[%s5122_s1 + $0xa8] ss:$16 sps:$4 sm:$0xff]  }
  0x21   :  { %1309 = vmatprep.subr.bf16.mxu1 %v3410_v33  ;;  %v3452_v3 = vld [vmem:[%s5122_s1 + $0x304] ss:$16 sps:$4 sm:$0xff]   ;;  %v3455_v5 = vld [vmem:[%s5122_s1 + $0x300] ss:$16 sps:$4 sm:$0xff]  }
  0x22   :  { %v27_v6 = vld [vmem:[%s5123_s0] sm:$0xff]  ;;  %v29_v8 = vld [vmem:[%s5123_s0 + $0x10] sm:$0xff] }
  0x23   :  { %1267 = vmatpush2.bf16.msra.mxu0 %v3412_v34  ;;  %v3458_v10 = vld [vmem:[%s5122_s1 + $0x4e4] ss:$16 sps:$4 sm:$0xff]   ;;  %v4155_v12 = vpack.c.bf16 %v34_v7, %v27_v6  ;;  %v4157_v13 = vpack.c.bf16 %v36_v9, %v29_v8  ;;  %v3456_v14 = vld [vmem:[%s5122_s1 + $0x4e0] ss:$16 sps:$4 sm:$0xff]   ;;  %v3485_v34 = vld [vmem:[%s5122_s1 + $0x8c] ss:$16 sps:$4 sm:$0xff]  }
  0x24   :  { %1310 = vmatpush2.bf16.msra.mxu1 %v3413_v35  ;;  %1268 = vmatprep.subr.bf16.mxu0 %v3414_v36  ;;  %v3461_v11 = vld [vmem:[%s5122_s1 + $0x604] ss:$16 sps:$4 sm:$0xff]   ;;  %v3459_v15 = vld [vmem:[%s5122_s1 + $0x600] ss:$16 sps:$4 sm:$0xff]   ;;  %v3483_v36 = vld [vmem:[%s5122_s1 + $0x88] ss:$16 sps:$4 sm:$0xff]  }
  0x25   :  { %1311 = vmatprep.subr.bf16.mxu1 %v3416_v37  ;;  %v3464_v16 = vld [vmem:[%s5122_s1 + $0x4c4] ss:$16 sps:$4 sm:$0xff]   ;;  %v3462_v18 = vld [vmem:[%s5122_s1 + $0x4c0] ss:$16 sps:$4 sm:$0xff]   ;;  %v3533_v6 = vld [vmem:[%s5122_s1 + $0x18c] ss:$16 sps:$4 sm:$0xff]  }
  0x26   :  { %v33_v19 = vld [vmem:[%s5123_s0 + $0x30] sm:$0xff]  ;;  %v3531_v8 = vld [vmem:[%s5122_s1 + $0x188] ss:$16 sps:$4 sm:$0xff]  }
  0x27   :  { %1269 = vmatpush2.bf16.msra.mxu0 %v3418_v38  ;;  %v3470_v22 = vld [vmem:[%s5122_s1 + $0x4a4] ss:$16 sps:$4 sm:$0xff]   ;;  %v4186_v23 = vpack.c.bf16 %v40_v20, %v33_v19  ;;  %v3468_v25 = vld [vmem:[%s5122_s1 + $0x4a0] ss:$16 sps:$4 sm:$0xff]   ;;  %v3491_v38 = vld [vmem:[%s5122_s1 + $0x6c] ss:$16 sps:$4 sm:$0xff]  }
  0x28   :  { %1312 = vmatpush2.bf16.msra.mxu1 %v3419_v39  ;;  %1270 = vmatprep.subr.bf16.mxu0 %v3420_v40  ;;  %v3476_v27 = vld [vmem:[%s5122_s1 + $0x484] ss:$16 sps:$4 sm:$0xff]   ;;  %v3474_v29 = vld [vmem:[%s5122_s1 + $0x480] ss:$16 sps:$4 sm:$0xff]   ;;  %v3489_v40 = vld [vmem:[%s5122_s1 + $0x68] ss:$16 sps:$4 sm:$0xff]  }
  0x29   :  { %1313 = vmatprep.subr.bf16.mxu1 %v3422_v41  ;;  %v3482_v31 = vld [vmem:[%s5122_s1 + $0x464] ss:$16 sps:$4 sm:$0xff]   ;;  %v3480_v33 = vld [vmem:[%s5122_s1 + $0x460] ss:$16 sps:$4 sm:$0xff]   ;;  %v32_v41 = vld [vmem:[%s5123_s0 + $0x28] sm:$0xff] }
  0x2a   :  { %v3488_v35 = vld [vmem:[%s5122_s1 + $0x444] ss:$16 sps:$4 sm:$0xff]   ;;  %v3486_v37 = vld [vmem:[%s5122_s1 + $0x440] ss:$16 sps:$4 sm:$0xff]  }
  0x2b   :  { %1271 = vmatpush2.bf16.msra.mxu0 %v3424_v42  ;;  %v3494_v39 = vld [vmem:[%s5122_s1 + $0x424] ss:$16 sps:$4 sm:$0xff]   ;;  %v3498_v48 = vld [vmem:[%s5122_s1 + $0x400] ss:$16 sps:$4 sm:$0xff]  }
  0x2c   :  { %1314 = vmatpush2.bf16.msra.mxu1 %v3425_v43  ;;  %1272 = vmatprep.subr.bf16.mxu0 %v3426_v44  ;;  %v39_v42 = vld [vmem:[%s5123_s0 + $0x60] sm:$0xff] }
  0x2d   :  { %1315 = vmatprep.subr.bf16.mxu1 %v3428_v45  ;;  %v3492_v43 = vld [vmem:[%s5122_s1 + $0x420] ss:$16 sps:$4 sm:$0xff]   ;;  %v4251_v44 = vpack.c.bf16 %v39_v42, %v32_v41  ;;  %v3497_v45 = vld [vmem:[%s5122_s1 + $0x4c] ss:$16 sps:$4 sm:$0xff]   ;;  %v3500_v46 = vld [vmem:[%s5122_s1 + $0x404] ss:$16 sps:$4 sm:$0xff]  }
  0x2e   :  { %v3536_v7 = vld [vmem:[%s5122_s1 + $0x544] ss:$16 sps:$4 sm:$0xff]   ;;  %v3534_v9 = vld [vmem:[%s5122_s1 + $0x540] ss:$16 sps:$4 sm:$0xff]   ;;  %v3573_v41 = vld [vmem:[%s5122_s1 + $0x4a8] ss:$16 sps:$4 sm:$0xff]  }
  0x2f   :  { %1273 = vmatpush2.bf16.msra.mxu0 %v3430_v50  ;;  %v3506_v50 = vld [vmem:[%s5122_s1 + $0x5e4] ss:$16 sps:$4 sm:$0xff]   ;;  %v3546_v19 = vld [vmem:[%s5122_s1 + $0x500] ss:$16 sps:$4 sm:$0xff]   ;;  %v3576_v42 = vld [vmem:[%s5122_s1 + $0x268] ss:$16 sps:$4 sm:$0xff]  }
  0x30   :  { %1316 = vmatpush2.bf16.msra.mxu1 %v3431_v51  ;;  %1274 = vmatprep.subr.bf16.mxu0 %v3432_v52  ;;  %v3501_v51 = vld [vmem:[%s5122_s1 + $0x28] ss:$16 sps:$4 sm:$0xff]   ;;  %v3504_v52 = vld [vmem:[%s5122_s1 + $0x5e0] ss:$16 sps:$4 sm:$0xff]  }
  0x31   :  { %1317 = vmatprep.subr.bf16.mxu1 %v3434_v55  ;;  %v3512_v55 = vld [vmem:[%s5122_s1 + $0x5c4] ss:$16 sps:$4 sm:$0xff]  }
  0x32   :  { %v31_v20 = vld [vmem:[%s5123_s0 + $0x20] sm:$0xff] }
  0x33   :  { %1275 = vmatpush2.bf16.msra.mxu0 %v3436_v56  ;;  %v3507_v56 = vld [vmem:[%s5122_s1 + $0x8] ss:$16 sps:$4 sm:$0xff]  }
  0x34   :  { %1318 = vmatpush2.bf16.msra.mxu1 %v3437_v57  ;;  %1276 = vmatprep.subr.bf16.mxu0 %v3438_v58  ;;  %v3510_v57 = vld [vmem:[%s5122_s1 + $0x5c0] ss:$16 sps:$4 sm:$0xff]   ;;  %v3515_v58 = vld [vmem:[%s5122_s1 + $0x1ec] ss:$16 sps:$4 sm:$0xff]  }
  0x35   :  { %1319 = vmatprep.subr.bf16.mxu1 %v3440_v59  ;;  %v3518_v59 = vld [vmem:[%s5122_s1 + $0x5a4] ss:$16 sps:$4 sm:$0xff]  }
  0x37   :  { %1277 = vmatpush2.bf16.msra.mxu0 %v3442_v60  ;;  %v3513_v60 = vld [vmem:[%s5122_s1 + $0x1e8] ss:$16 sps:$4 sm:$0xff]  }
  0x38   :  { %1320 = vmatpush2.bf16.msra.mxu1 %v3443_v61  ;;  %1278 = vmatprep.subr.bf16.mxu0 %v3444_v62  ;;  %v3516_v61 = vld [vmem:[%s5122_s1 + $0x5a0] ss:$16 sps:$4 sm:$0xff]   ;;  %v3521_v62 = vld [vmem:[%s5122_s1 + $0x1cc] ss:$16 sps:$4 sm:$0xff]  }
  0x39   :  { %1321 = vmatprep.subr.bf16.mxu1 %v3446_v63  ;;  %v3524_v63 = vld [vmem:[%s5122_s1 + $0x584] ss:$16 sps:$4 sm:$0xff]  }
  0x3b   :  { %1279 = vmatpush2.bf16.msra.mxu0 %v3448_v0  ;;  %v3519_v0 = vld [vmem:[%s5122_s1 + $0x1c8] ss:$16 sps:$4 sm:$0xff]  }
  0x3c   :  { %1322 = vmatpush2.bf16.msra.mxu1 %v3449_v1  ;;  %1280 = vmatprep.subr.bf16.mxu0 %v3450_v2  ;;  %v3522_v1 = vld [vmem:[%s5122_s1 + $0x580] ss:$16 sps:$4 sm:$0xff]   ;;  %v3527_v2 = vld [vmem:[%s5122_s1 + $0x1ac] ss:$16 sps:$4 sm:$0xff]  }
  0x3d   :  { %1323 = vmatprep.subr.bf16.mxu1 %v3452_v3  ;;  %v3530_v3 = vld [vmem:[%s5122_s1 + $0x564] ss:$16 sps:$4 sm:$0xff]  }
  0x3f   :  { %1281 = vmatpush2.bf16.msra.mxu0 %v3454_v4  ;;  %v3525_v4 = vld [vmem:[%s5122_s1 + $0x1a8] ss:$16 sps:$4 sm:$0xff]  }
  0x40   :  { %1324 = vmatpush2.bf16.msra.mxu1 %v3455_v5  ;;  %1336 = vmatprep.subr.bf16.mxu0 %v3458_v10  ;;  %v3528_v5 = vld [vmem:[%s5122_s1 + $0x560] ss:$16 sps:$4 sm:$0xff]   ;;  %v3539_v10 = vld [vmem:[%s5122_s1 + $0x16c] ss:$16 sps:$4 sm:$0xff]  }
  0x41   :  { %1393 = vmatprep.subr.bf16.mxu1 %v3461_v11  ;;  %v3542_v11 = vld [vmem:[%s5122_s1 + $0x524] ss:$16 sps:$4 sm:$0xff]  }
  0x42   :  { %1283 = vmatmul.mubr.bf16.vlgmr.msra.gmra.mxu0 %v4155_v12 }
  0x43   :  { %1326 = vmatmul.mubr.bf16.vlgmr.msra.gmra.mxu1 %v4157_v13  ;;  %1337 = vmatpush1.bf16.msra.mxu0 %v3456_v14  ;;  %v3537_v14 = vld [vmem:[%s5122_s1 + $0x168] ss:$16 sps:$4 sm:$0xff]  }
  0x44   :  { %1394 = vmatpush1.bf16.msra.mxu1 %v3459_v15  ;;  %1338 = vmatprep.subr.bf16.mxu0 %v3464_v16  ;;  %v3540_v15 = vld [vmem:[%s5122_s1 + $0x520] ss:$16 sps:$4 sm:$0xff]   ;;  %v3545_v16 = vld [vmem:[%s5122_s1 + $0x14c] ss:$16 sps:$4 sm:$0xff]  }
  0x45   :  { %1411 = vmatprep.mubr.bf16.mxu1 %v3886_v21  ;;  %1422 = vmatprep.subr.bf16.mxu1 %v3467_v17  ;;  %v3548_v17 = vld [vmem:[%s5122_s1 + $0x504] ss:$16 sps:$4 sm:$0xff]  }
  0x46   :  { %1368 = vmatprep.mubr.bf16.mxu0 %v4251_v44 }
  0x47   :  { %1339 = vmatpush1.bf16.msra.mxu0 %v3462_v18  ;;  %v3543_v18 = vld [vmem:[%s5122_s1 + $0x148] ss:$16 sps:$4 sm:$0xff]  }
  0x48   :  { %1340 = vmatprep.subr.bf16.mxu0 %v3470_v22  ;;  %v38_v22 = vld [vmem:[%s5123_s0 + $0x58] sm:$0xff] }
  0x4b   :  { %3152 = vmatmul.mubr.msk.bf16.vlgmr.msra.gmra.mxu1 %vm1246_vm0, %v4186_v23  ;;  %1341 = vmatpush1.bf16.msra.mxu0 %v3468_v25  ;;  %v3554_v25 = vld [vmem:[%s5122_s1 + $0x2ec] ss:$16 sps:$4 sm:$0xff]  }
  0x4c   :  { %1423 = vmatpush1.bf16.msra.mxu1 %v3465_v24  ;;  %1342 = vmatprep.subr.bf16.mxu0 %v3476_v27  ;;  %v3551_v24 = vld [vmem:[%s5122_s1 + $0x12c] ss:$16 sps:$4 sm:$0xff]   ;;  %v3549_v27 = vld [vmem:[%s5122_s1 + $0x128] ss:$16 sps:$4 sm:$0xff]  }
  0x4d   :  { %1424 = vmatprep.subr.bf16.mxu1 %v3473_v26  ;;  %1454 = vmatprep.mubr.bf16.mxu1 %v4086_v53  ;;  %v3509_v53 = vld [vmem:[%s5122_s1 + $0xc] ss:$16 sps:$4 sm:$0xff]   ;;  %v4374_v26 = vpack.c.bf16 %v38_v22, %v31_v20  ;;  %v3633_v20 = vld [vmem:[%s5122_s1 + $0x568] ss:$16 sps:$4 sm:$0xff]  }
  0x4e   :  { %v3636_v22 = vld [vmem:[%s5122_s1 + $0x328] ss:$16 sps:$4 sm:$0xff]  }
  0x4f   :  { %1343 = vmatpush1.bf16.msra.mxu0 %v3474_v29  ;;  %v3557_v29 = vld [vmem:[%s5122_s1 + $0x10c] ss:$16 sps:$4 sm:$0xff]  }
  0x50   :  { %1425 = vmatpush1.bf16.msra.mxu1 %v3471_v28  ;;  %1344 = vmatprep.subr.bf16.mxu0 %v3482_v31  ;;  %v3552_v28 = vld [vmem:[%s5122_s1 + $0x2e8] ss:$16 sps:$4 sm:$0xff]  }
  0x51   :  { %1426 = vmatprep.subr.bf16.mxu1 %v3479_v30  ;;  %v3560_v30 = vld [vmem:[%s5122_s1 + $0x2cc] ss:$16 sps:$4 sm:$0xff]   ;;  %v3555_v31 = vld [vmem:[%s5122_s1 + $0x108] ss:$16 sps:$4 sm:$0xff]  }
  0x53   :  { %1345 = vmatpush1.bf16.msra.mxu0 %v3480_v33  ;;  %v3563_v33 = vld [vmem:[%s5122_s1 + $0x4ec] ss:$16 sps:$4 sm:$0xff]  }
  0x54   :  { %1427 = vmatpush1.bf16.msra.mxu1 %v3477_v32  ;;  %1346 = vmatprep.subr.bf16.mxu0 %v3488_v35  ;;  %v3558_v32 = vld [vmem:[%s5122_s1 + $0x2c8] ss:$16 sps:$4 sm:$0xff]  }
  0x55   :  { %1428 = vmatprep.subr.bf16.mxu1 %v3485_v34  ;;  %v3566_v34 = vld [vmem:[%s5122_s1 + $0x2ac] ss:$16 sps:$4 sm:$0xff]   ;;  %v3561_v35 = vld [vmem:[%s5122_s1 + $0x4e8] ss:$16 sps:$4 sm:$0xff]  }
  0x57   :  { %1347 = vmatpush1.bf16.msra.mxu0 %v3486_v37  ;;  %v3569_v37 = vld [vmem:[%s5122_s1 + $0x4cc] ss:$16 sps:$4 sm:$0xff]  }
  0x58   :  { %1429 = vmatpush1.bf16.msra.mxu1 %v3483_v36  ;;  %1348 = vmatprep.subr.bf16.mxu0 %v3494_v39  ;;  %v3564_v36 = vld [vmem:[%s5122_s1 + $0x2a8] ss:$16 sps:$4 sm:$0xff]  }
  0x59   :  { %1430 = vmatprep.subr.bf16.mxu1 %v3491_v38  ;;  %v3567_v38 = vld [vmem:[%s5122_s1 + $0x4c8] ss:$16 sps:$4 sm:$0xff]  }
  0x5a   :  { %v3570_v39 = vld [vmem:[%s5122_s1 + $0x288] ss:$16 sps:$4 sm:$0xff]  }
  0x5b   :  { %1349 = vmatpush1.bf16.msra.mxu0 %v3492_v43  ;;  %v3581_v43 = vld [vmem:[%s5122_s1 + $0x48c] ss:$16 sps:$4 sm:$0xff]  }
  0x5c   :  { %1431 = vmatpush1.bf16.msra.mxu1 %v3489_v40  ;;  %1350 = vmatprep.subr.bf16.mxu0 %v3500_v46  ;;  %v3575_v40 = vld [vmem:[%s5122_s1 + $0x4ac] ss:$16 sps:$4 sm:$0xff]   ;;  %v3582_v46 = vld [vmem:[%s5122_s1 + $0x248] ss:$16 sps:$4 sm:$0xff]  }
  0x5d   :  { %1432 = vmatprep.subr.bf16.mxu1 %v3497_v45  ;;  %v3579_v45 = vld [vmem:[%s5122_s1 + $0x488] ss:$16 sps:$4 sm:$0xff]  }
  0x5f   :  { %1351 = vmatpush1.bf16.msra.mxu0 %v3498_v48  ;;  %v3590_v48 = vld [vmem:[%s5122_s1 + $0x22c] ss:$16 sps:$4 sm:$0xff]  }
  0x60   :  { %1433 = vmatpush1.bf16.msra.mxu1 %v3495_v47  ;;  %1352 = vmatprep.subr.bf16.mxu0 %v3506_v50  ;;  %v3587_v47 = vld [vmem:[%s5122_s1 + $0x46c] ss:$16 sps:$4 sm:$0xff]   ;;  %v3588_v50 = vld [vmem:[%s5122_s1 + $0x228] ss:$16 sps:$4 sm:$0xff]  }
  0x61   :  { %1434 = vmatprep.subr.bf16.mxu1 %v3503_v49  ;;  %v3585_v49 = vld [vmem:[%s5122_s1 + $0x468] ss:$16 sps:$4 sm:$0xff]  }
  0x63   :  { %1353 = vmatpush2.bf16.msra.mxu0 %v3504_v52  ;;  %v3596_v52 = vld [vmem:[%s5122_s1 + $0x20c] ss:$16 sps:$4 sm:$0xff]  }
  0x64   :  { %1435 = vmatpush1.bf16.msra.mxu1 %v3501_v51  ;;  %1354 = vmatprep.subr.bf16.mxu0 %v3512_v55  ;;  %v3593_v51 = vld [vmem:[%s5122_s1 + $0x44c] ss:$16 sps:$4 sm:$0xff]   ;;  %v3594_v55 = vld [vmem:[%s5122_s1 + $0x208] ss:$16 sps:$4 sm:$0xff]  }
  0x65   :  { %1436 = vmatprep.subr.bf16.mxu1 %v3509_v53  ;;  %v3591_v53 = vld [vmem:[%s5122_s1 + $0x448] ss:$16 sps:$4 sm:$0xff]  }
  0x67   :  { %1355 = vmatpush2.bf16.msra.mxu0 %v3510_v57  ;;  %v3602_v57 = vld [vmem:[%s5122_s1 + $0x3ec] ss:$16 sps:$4 sm:$0xff]  }
  0x68   :  { %1437 = vmatpush1.bf16.msra.mxu1 %v3507_v56  ;;  %1356 = vmatprep.subr.bf16.mxu0 %v3518_v59  ;;  %v3599_v56 = vld [vmem:[%s5122_s1 + $0x42c] ss:$16 sps:$4 sm:$0xff]   ;;  %v3600_v59 = vld [vmem:[%s5122_s1 + $0x3e8] ss:$16 sps:$4 sm:$0xff]  }
  0x69   :  { %1438 = vmatprep.subr.bf16.mxu1 %v3515_v58  ;;  %v3597_v58 = vld [vmem:[%s5122_s1 + $0x428] ss:$16 sps:$4 sm:$0xff]  }
  0x6b   :  { %1357 = vmatpush2.bf16.msra.mxu0 %v3516_v61  ;;  %v3608_v61 = vld [vmem:[%s5122_s1 + $0x3cc] ss:$16 sps:$4 sm:$0xff]  }
  0x6c   :  { %1439 = vmatpush2.bf16.msra.mxu1 %v3513_v60  ;;  %1358 = vmatprep.subr.bf16.mxu0 %v3524_v63  ;;  %v3605_v60 = vld [vmem:[%s5122_s1 + $0x40c] ss:$16 sps:$4 sm:$0xff]   ;;  %v3606_v63 = vld [vmem:[%s5122_s1 + $0x3c8] ss:$16 sps:$4 sm:$0xff]  }
  0x6d   :  { %1440 = vmatprep.subr.bf16.mxu1 %v3521_v62  ;;  %v3603_v62 = vld [vmem:[%s5122_s1 + $0x408] ss:$16 sps:$4 sm:$0xff]  }
  0x6f   :  { %1359 = vmatpush2.bf16.msra.mxu0 %v3522_v1  ;;  %v3614_v1 = vld [vmem:[%s5122_s1 + $0x3ac] ss:$16 sps:$4 sm:$0xff]  }
  0x70   :  { %1441 = vmatpush2.bf16.msra.mxu1 %v3519_v0  ;;  %1360 = vmatprep.subr.bf16.mxu0 %v3530_v3  ;;  %v3611_v0 = vld [vmem:[%s5122_s1 + $0x5ec] ss:$16 sps:$4 sm:$0xff]   ;;  %v3612_v3 = vld [vmem:[%s5122_s1 + $0x3a8] ss:$16 sps:$4 sm:$0xff]  }
  0x71   :  { %1442 = vmatprep.subr.bf16.mxu1 %v3527_v2  ;;  %v3609_v2 = vld [vmem:[%s5122_s1 + $0x5e8] ss:$16 sps:$4 sm:$0xff]  }
  0x73   :  { %1361 = vmatpush2.bf16.msra.mxu0 %v3528_v5  ;;  %v3620_v5 = vld [vmem:[%s5122_s1 + $0x38c] ss:$16 sps:$4 sm:$0xff]  }
  0x74   :  { %1443 = vmatpush2.bf16.msra.mxu1 %v3525_v4  ;;  %1362 = vmatprep.subr.bf16.mxu0 %v3536_v7  ;;  %v3617_v4 = vld [vmem:[%s5122_s1 + $0x5cc] ss:$16 sps:$4 sm:$0xff]   ;;  %v3618_v7 = vld [vmem:[%s5122_s1 + $0x388] ss:$16 sps:$4 sm:$0xff]  }
  0x75   :  { %1444 = vmatprep.subr.bf16.mxu1 %v3533_v6  ;;  %v3615_v6 = vld [vmem:[%s5122_s1 + $0x5c8] ss:$16 sps:$4 sm:$0xff]  }
  0x77   :  { %1363 = vmatpush2.bf16.msra.mxu0 %v3534_v9  ;;  %v3626_v9 = vld [vmem:[%s5122_s1 + $0x36c] ss:$16 sps:$4 sm:$0xff]  }
  0x78   :  { %1445 = vmatpush2.bf16.msra.mxu1 %v3531_v8  ;;  %1364 = vmatprep.subr.bf16.mxu0 %v3542_v11  ;;  %v3623_v8 = vld [vmem:[%s5122_s1 + $0x5ac] ss:$16 sps:$4 sm:$0xff]   ;;  %v3624_v11 = vld [vmem:[%s5122_s1 + $0x368] ss:$16 sps:$4 sm:$0xff]  }
  0x79   :  { %1446 = vmatprep.subr.bf16.mxu1 %v3539_v10  ;;  %v3621_v10 = vld [vmem:[%s5122_s1 + $0x5a8] ss:$16 sps:$4 sm:$0xff]  }
  0x7b   :  { %1365 = vmatpush2.bf16.msra.mxu0 %v3540_v15  ;;  %v3632_v15 = vld [vmem:[%s5122_s1 + $0x34c] ss:$16 sps:$4 sm:$0xff]  }
  0x7c   :  { %1447 = vmatpush2.bf16.msra.mxu1 %v3537_v14  ;;  %1366 = vmatprep.subr.bf16.mxu0 %v3548_v17  ;;  %v3629_v14 = vld [vmem:[%s5122_s1 + $0x58c] ss:$16 sps:$4 sm:$0xff]   ;;  %v3630_v17 = vld [vmem:[%s5122_s1 + $0x348] ss:$16 sps:$4 sm:$0xff]  }
  0x7d   :  { %1448 = vmatprep.subr.bf16.mxu1 %v3545_v16  ;;  %v3627_v16 = vld [vmem:[%s5122_s1 + $0x588] ss:$16 sps:$4 sm:$0xff]  }
  0x7f   :  { %1367 = vmatpush2.bf16.msra.mxu0 %v3546_v19  ;;  %v3638_v19 = vld [vmem:[%s5122_s1 + $0x32c] ss:$16 sps:$4 sm:$0xff]  }
  0x80   :  { %1449 = vmatpush2.bf16.msra.mxu1 %v3543_v18  ;;  %1465 = vmatprep.subr.bf16.mxu0 %v3554_v25  ;;  %v3635_v18 = vld [vmem:[%s5122_s1 + $0x56c] ss:$16 sps:$4 sm:$0xff]  }
  0x81   :  { %1450 = vmatprep.subr.bf16.mxu1 %v3551_v24  ;;  %v3641_v24 = vld [vmem:[%s5122_s1 + $0x54c] ss:$16 sps:$4 sm:$0xff]  }
  0x82   :  { %1369 = vmatmul.mubr.bf16.vlgmr.msra.gmra.mxu0 %v4374_v26  ;;  %v3644_v25 = vld [vmem:[%s5122_s1 + $0x30c] ss:$16 sps:$4 sm:$0xff]  }
  0x83   :  { %1466 = vmatpush1.bf16.msra.mxu0 %v3552_v28  ;;  %1497 = vmatprep.mubr.bf16.mxu0 %v4088_v54  ;;  %v3572_v54 = vld [vmem:[%s5122_s1 + $0x28c] ss:$16 sps:$4 sm:$0xff]   ;;  %v3642_v28 = vld [vmem:[%s5122_s1 + $0x308] ss:$16 sps:$4 sm:$0xff]  }
  0x84   :  { %1451 = vmatpush2.bf16.msra.mxu1 %v3549_v27  ;;  %1467 = vmatprep.subr.bf16.mxu0 %v3560_v30  ;;  %v3639_v27 = vld [vmem:[%s5122_s1 + $0x548] ss:$16 sps:$4 sm:$0xff]   ;;  %v3650_v30 = vld [vmem:[%s5122_s1 + $0x60c] ss:$16 sps:$4 sm:$0xff]  }
  0x85   :  { %1452 = vmatprep.subr.bf16.mxu1 %v3557_v29  ;;  %v3647_v29 = vld [vmem:[%s5122_s1 + $0x52c] ss:$16 sps:$4 sm:$0xff]  }
  0x87   :  { %1468 = vmatpush1.bf16.msra.mxu0 %v3558_v32  ;;  %v3648_v32 = vld [vmem:[%s5122_s1 + $0x608] ss:$16 sps:$4 sm:$0xff]  }
  0x88   :  { %1453 = vmatpush2.bf16.msra.mxu1 %v3555_v31  ;;  %1469 = vmatprep.subr.bf16.mxu0 %v3566_v34  ;;  %v3645_v31 = vld [vmem:[%s5122_s1 + $0x528] ss:$16 sps:$4 sm:$0xff]   ;;  %v3656_v34 = vld [vmem:[%s5124_s3 + $0xe4] ss:$16 sps:$4 sm:$0xff]  }
  0x89   :  { %1508 = vmatprep.subr.bf16.mxu1 %v3563_v33  ;;  %v3653_v33 = vld [vmem:[%s5122_s1 + $0x50c] ss:$16 sps:$4 sm:$0xff]  }
  0x8b   :  { %1455 = vmatmul.mubr.bf16.vlgmr.msra.gmra.mxu1 %v4155_v12  ;;  %1470 = vmatpush1.bf16.msra.mxu0 %v3564_v36  ;;  %v3578_v12 = vld [vmem:[%s5122_s1 + $0x26c] ss:$16 sps:$4 sm:$0xff]   ;;  %v3654_v36 = vld [vmem:[%s5124_s3 + $0xe0] ss:$16 sps:$4 sm:$0xff]  }
  0x8c   :  { %1509 = vmatpush1.bf16.msra.mxu1 %v3561_v35  ;;  %1471 = vmatprep.subr.bf16.mxu0 %v3572_v54  ;;  %v3651_v35 = vld [vmem:[%s5122_s1 + $0x508] ss:$16 sps:$4 sm:$0xff]   ;;  %v3660_v54 = vld [vmem:[%s5124_s3 + $0xa0] ss:$16 sps:$4 sm:$0xff]  }
  0x8d   :  { %1510 = vmatprep.subr.bf16.mxu1 %v3569_v37  ;;  %1540 = vmatprep.mubr.bf16.mxu1 %v4251_v44  ;;  %v3584_v44 = vld [vmem:[%s5122_s1 + $0x24c] ss:$16 sps:$4 sm:$0xff]   ;;  %v3659_v37 = vld [vmem:[%s5124_s3 + $0xc4] ss:$16 sps:$4 sm:$0xff]  }
  0x8f   :  { %1472 = vmatpush1.bf16.msra.mxu0 %v3570_v39  ;;  %v3666_v39 = vld [vmem:[%s5124_s3 + $0x60] ss:$16 sps:$4 sm:$0xff]  }
  0x90   :  { %1511 = vmatpush1.bf16.msra.mxu1 %v3567_v38  ;;  %1473 = vmatprep.subr.bf16.mxu0 %v3578_v12  ;;  %v3668_v38 = vld [vmem:[%s5124_s3 + $0x64] ss:$16 sps:$4 sm:$0xff]  }
  0x91   :  { %1512 = vmatprep.subr.bf16.mxu1 %v3575_v40  ;;  %v3708_v40 = vld [vmem:[%s5124_s3 + $0x2e0] ss:$16 sps:$4 sm:$0xff]   ;;  %v3710_v12 = vld [vmem:[%s5124_s3 + $0x2e4] ss:$16 sps:$4 sm:$0xff]  }
  0x93   :  { %1474 = vmatpush1.bf16.msra.mxu0 %v3576_v42  ;;  %v3669_v42 = vld [vmem:[%s5124_s3 + $0x40] ss:$16 sps:$4 sm:$0xff]  }
  0x94   :  { %1513 = vmatpush1.bf16.msra.mxu1 %v3573_v41  ;;  %1475 = vmatprep.subr.bf16.mxu0 %v3584_v44  ;;  %v3671_v41 = vld [vmem:[%s5124_s3 + $0x44] ss:$16 sps:$4 sm:$0xff]  }
  0x95   :  { %1514 = vmatprep.subr.bf16.mxu1 %v3581_v43  ;;  %v3714_v43 = vld [vmem:[%s5124_s3 + $0x2c0] ss:$16 sps:$4 sm:$0xff]   ;;  %v3716_v44 = vld [vmem:[%s5124_s3 + $0x2c4] ss:$16 sps:$4 sm:$0xff]  }
  0x97   :  { %1476 = vmatpush1.bf16.msra.mxu0 %v3582_v46  ;;  %v3672_v46 = vld [vmem:[%s5124_s3 + $0x20] ss:$16 sps:$4 sm:$0xff]  }
  0x98   :  { %1515 = vmatpush1.bf16.msra.mxu1 %v3579_v45  ;;  %1477 = vmatprep.subr.bf16.mxu0 %v3590_v48  ;;  %v3674_v45 = vld [vmem:[%s5124_s3 + $0x24] ss:$16 sps:$4 sm:$0xff]  }
  0x99   :  { %1516 = vmatprep.subr.bf16.mxu1 %v3587_v47  ;;  %v3720_v47 = vld [vmem:[%s5124_s3 + $0x2a0] ss:$16 sps:$4 sm:$0xff]   ;;  %v3722_v48 = vld [vmem:[%s5124_s3 + $0x2a4] ss:$16 sps:$4 sm:$0xff]  }
  0x9b   :  { %1478 = vmatpush1.bf16.msra.mxu0 %v3588_v50  ;;  %v3675_v50 = vld [vmem:[%s5124_s3] ss:$16 sps:$4 sm:$0xff]  }
  0x9c   :  { %1517 = vmatpush1.bf16.msra.mxu1 %v3585_v49  ;;  %1479 = vmatprep.subr.bf16.mxu0 %v3596_v52  ;;  %v3677_v49 = vld [vmem:[%s5124_s3 + $0x4] ss:$16 sps:$4 sm:$0xff]  }
  0x9d   :  { %1518 = vmatprep.subr.bf16.mxu1 %v3593_v51  ;;  %v3726_v51 = vld [vmem:[%s5124_s3 + $0x280] ss:$16 sps:$4 sm:$0xff]   ;;  %v3728_v52 = vld [vmem:[%s5124_s3 + $0x284] ss:$16 sps:$4 sm:$0xff]  }
  0x9f   :  { %1480 = vmatpush1.bf16.msra.mxu0 %v3594_v55  ;;  %v3678_v55 = vld [vmem:[%s5124_s3 + $0x1e0] ss:$16 sps:$4 sm:$0xff]  }
  0xa0   :  { %1519 = vmatpush1.bf16.msra.mxu1 %v3591_v53  ;;  %1481 = vmatprep.subr.bf16.mxu0 %v3602_v57  ;;  %v3680_v53 = vld [vmem:[%s5124_s3 + $0x1e4] ss:$16 sps:$4 sm:$0xff]  }
  0xa1   :  { %1520 = vmatprep.subr.bf16.mxu1 %v3599_v56  ;;  %v3732_v56 = vld [vmem:[%s5124_s3 + $0x260] ss:$16 sps:$4 sm:$0xff]   ;;  %v3734_v57 = vld [vmem:[%s5124_s3 + $0x264] ss:$16 sps:$4 sm:$0xff]  }
  0xa3   :  { %1482 = vmatpush2.bf16.msra.mxu0 %v3600_v59  ;;  %v3681_v59 = vld [vmem:[%s5124_s3 + $0x1c0] ss:$16 sps:$4 sm:$0xff]  }
  0xa4   :  { %1521 = vmatpush1.bf16.msra.mxu1 %v3597_v58  ;;  %1483 = vmatprep.subr.bf16.mxu0 %v3608_v61  ;;  %v3683_v58 = vld [vmem:[%s5124_s3 + $0x1c4] ss:$16 sps:$4 sm:$0xff]  }
  0xa5   :  { %1522 = vmatprep.subr.bf16.mxu1 %v3605_v60  ;;  %v3738_v60 = vld [vmem:[%s5124_s3 + $0x240] ss:$16 sps:$4 sm:$0xff]   ;;  %v3740_v61 = vld [vmem:[%s5124_s3 + $0x244] ss:$16 sps:$4 sm:$0xff]  }
  0xa7   :  { %1484 = vmatpush2.bf16.msra.mxu0 %v3606_v63  ;;  %v3684_v63 = vld [vmem:[%s5124_s3 + $0x1a0] ss:$16 sps:$4 sm:$0xff]  }
  0xa8   :  { %1523 = vmatpush1.bf16.msra.mxu1 %v3603_v62  ;;  %1485 = vmatprep.subr.bf16.mxu0 %v3614_v1  ;;  %v3686_v62 = vld [vmem:[%s5124_s3 + $0x1a4] ss:$16 sps:$4 sm:$0xff]  }
  0xa9   :  { %1524 = vmatprep.subr.bf16.mxu1 %v3611_v0  ;;  %v3744_v0 = vld [vmem:[%s5124_s3 + $0x220] ss:$16 sps:$4 sm:$0xff]   ;;  %v3746_v1 = vld [vmem:[%s5124_s3 + $0x224] ss:$16 sps:$4 sm:$0xff]  }
  0xab   :  { %1486 = vmatpush2.bf16.msra.mxu0 %v3612_v3  ;;  %v3687_v3 = vld [vmem:[%s5124_s3 + $0x180] ss:$16 sps:$4 sm:$0xff]  }
  0xac   :  { %1525 = vmatpush2.bf16.msra.mxu1 %v3609_v2  ;;  %1487 = vmatprep.subr.bf16.mxu0 %v3620_v5  ;;  %v3689_v2 = vld [vmem:[%s5124_s3 + $0x184] ss:$16 sps:$4 sm:$0xff]  }
  0xad   :  { %1526 = vmatprep.subr.bf16.mxu1 %v3617_v4  ;;  %v3750_v4 = vld [vmem:[%s5124_s3 + $0x200] ss:$16 sps:$4 sm:$0xff]   ;;  %v3752_v5 = vld [vmem:[%s5124_s3 + $0x204] ss:$16 sps:$4 sm:$0xff]  }
  0xaf   :  { %1488 = vmatpush2.bf16.msra.mxu0 %v3618_v7  ;;  %v3690_v7 = vld [vmem:[%s5124_s3 + $0x160] ss:$16 sps:$4 sm:$0xff]  }
  0xb0   :  { %1527 = vmatpush2.bf16.msra.mxu1 %v3615_v6  ;;  %1489 = vmatprep.subr.bf16.mxu0 %v3626_v9  ;;  %v3692_v6 = vld [vmem:[%s5124_s3 + $0x164] ss:$16 sps:$4 sm:$0xff]  }
  0xb1   :  { %1528 = vmatprep.subr.bf16.mxu1 %v3623_v8  ;;  %v3756_v8 = vld [vmem:[%s5124_s3 + $0x3e0] ss:$16 sps:$4 sm:$0xff]   ;;  %v3758_v9 = vld [vmem:[%s5124_s3 + $0x3e4] ss:$16 sps:$4 sm:$0xff]  }
  0xb3   :  { %1490 = vmatpush2.bf16.msra.mxu0 %v3624_v11  ;;  %v3693_v11 = vld [vmem:[%s5124_s3 + $0x140] ss:$16 sps:$4 sm:$0xff]  }
  0xb4   :  { %1529 = vmatpush2.bf16.msra.mxu1 %v3621_v10  ;;  %1491 = vmatprep.subr.bf16.mxu0 %v3632_v15  ;;  %v3695_v10 = vld [vmem:[%s5124_s3 + $0x144] ss:$16 sps:$4 sm:$0xff]  }
  0xb5   :  { %1530 = vmatprep.subr.bf16.mxu1 %v3629_v14  ;;  %v3762_v14 = vld [vmem:[%s5124_s3 + $0x3c0] ss:$16 sps:$4 sm:$0xff]   ;;  %v3764_v15 = vld [vmem:[%s5124_s3 + $0x3c4] ss:$16 sps:$4 sm:$0xff]  }
  0xb7   :  { %1492 = vmatpush2.bf16.msra.mxu0 %v3630_v17  ;;  %v3696_v17 = vld [vmem:[%s5124_s3 + $0x120] ss:$16 sps:$4 sm:$0xff]  }
  0xb8   :  { %1531 = vmatpush2.bf16.msra.mxu1 %v3627_v16  ;;  %1493 = vmatprep.subr.bf16.mxu0 %v3638_v19  ;;  %v3698_v16 = vld [vmem:[%s5124_s3 + $0x124] ss:$16 sps:$4 sm:$0xff]  }
  0xb9   :  { %1532 = vmatprep.subr.bf16.mxu1 %v3635_v18  ;;  %v3768_v18 = vld [vmem:[%s5124_s3 + $0x3a0] ss:$16 sps:$4 sm:$0xff]   ;;  %v3770_v19 = vld [vmem:[%s5124_s3 + $0x3a4] ss:$16 sps:$4 sm:$0xff]  }
  0xbb   :  { %1494 = vmatpush2.bf16.msra.mxu0 %v3636_v22  ;;  %v3699_v22 = vld [vmem:[%s5124_s3 + $0x100] ss:$16 sps:$4 sm:$0xff]  }
  0xbc   :  { %1533 = vmatpush2.bf16.msra.mxu1 %v3633_v20  ;;  %1495 = vmatprep.subr.bf16.mxu0 %v3644_v25  ;;  %v3701_v20 = vld [vmem:[%s5124_s3 + $0x104] ss:$16 sps:$4 sm:$0xff]   ;;  %v3704_v25 = vld [vmem:[%s5124_s3 + $0xec] ss:$16 sps:$4 sm:$0xff]  }
  0xbd   :  { %1534 = vmatprep.subr.bf16.mxu1 %v3641_v24  ;;  %v3776_v24 = vld [vmem:[%s5124_s3 + $0x384] ss:$16 sps:$4 sm:$0xff]  }
  0xbf   :  { %1496 = vmatpush2.bf16.msra.mxu0 %v3642_v28  ;;  %v3782_v28 = vld [vmem:[%s5124_s3 + $0x364] ss:$16 sps:$4 sm:$0xff]  }
  0xc0   :  { %1535 = vmatpush2.bf16.msra.mxu1 %v3639_v27  ;;  %1565 = vmatprep.subr.bf16.mxu0 %v3650_v30  ;;  %v3774_v27 = vld [vmem:[%s5124_s3 + $0x380] ss:$16 sps:$4 sm:$0xff]   ;;  %v3788_v30 = vld [vmem:[%s5124_s3 + $0x344] ss:$16 sps:$4 sm:$0xff]  }
  0xc1   :  { %1536 = vmatprep.subr.bf16.mxu1 %v3647_v29  ;;  %v3780_v29 = vld [vmem:[%s5124_s3 + $0x360] ss:$16 sps:$4 sm:$0xff]  }
  0xc2   :  { %1498 = vmatmul.mubr.bf16.vlgmr.msra.gmra.mxu0 %v4157_v13  ;;  %v3657_v13 = vld [vmem:[%s5124_s3 + $0xc0] ss:$16 sps:$4 sm:$0xff]  }
  0xc3   :  { %1566 = vmatpush1.bf16.msra.mxu0 %v3648_v32  ;;  %1583 = vmatprep.mubr.bf16.mxu0 %v3886_v21  ;;  %v3662_v21 = vld [vmem:[%s5124_s3 + $0xa4] ss:$16 sps:$4 sm:$0xff]  }
  0xc4   :  { %1537 = vmatpush2.bf16.msra.mxu1 %v3645_v31  ;;  %2396 = vmatprep.subr.bf16.mxu0 %v3656_v34  ;;  %v3786_v31 = vld [vmem:[%s5124_s3 + $0x340] ss:$16 sps:$4 sm:$0xff]   ;;  %v3794_v32 = vld [vmem:[%s5124_s3 + $0x324] ss:$16 sps:$4 sm:$0xff]  }
  0xc5   :  { %1538 = vmatprep.subr.bf16.mxu1 %v3653_v33  ;;  %v3792_v33 = vld [vmem:[%s5124_s3 + $0x320] ss:$16 sps:$4 sm:$0xff]   ;;  %v3797_v34 = vld [vmem:[%s5124_s3 + $0x304] ss:$16 sps:$4 sm:$0xff]  }
  0xc8   :  { %1539 = vmatpush2.bf16.msra.mxu1 %v3651_v35  ;;  %v3795_v35 = vld [vmem:[%s5124_s3 + $0x300] ss:$16 sps:$4 sm:$0xff]  }
  0xc9   :  { %2439 = vmatprep.subr.bf16.mxu1 %v3710_v12  ;;  %v4795_v12 = vld [vmem:[%s5125_s2] sm:$0xf] }
  0xca   :  { %3153 = vmatmul.mubr.msk.bf16.vlgmr.msra.gmra.mxu0 %vm1246_vm0, %v4186_v23  ;;  %v3665_v23 = vld [vmem:[%s5124_s3 + $0x84] ss:$16 sps:$4 sm:$0xff]  }
  0xcb   :  { %1541 = vmatmul.mubr.bf16.vlgmr.msra.gmra.mxu1 %v4374_v26  ;;  %2397 = vmatpush1.bf16.msra.mxu0 %v3654_v36  ;;  %v3663_v26 = vld [vmem:[%s5124_s3 + $0x80] ss:$16 sps:$4 sm:$0xff]   ;;  %v3800_v36 = vld [vmem:[%s5124_s3 + $0x2ec] ss:$16 sps:$4 sm:$0xff]  }
  0xcc   :  { %2398 = vmatprep.subr.bf16.mxu0 %v3659_v37  ;;  %2440 = vmatpush1.bf16.msra.mxu1 %v3708_v40 }
  0xcd   :  { %2441 = vmatprep.subr.bf16.mxu1 %v3716_v44 }
  0xcf   :  { %2399 = vmatpush1.bf16.msra.mxu0 %v3657_v13  ;;  %v246_v13 = vlaneseq }
  0xd0   :  { %2400 = vmatprep.subr.bf16.mxu0 %v3662_v21  ;;  %2442 = vmatpush1.bf16.msra.mxu1 %v3714_v43 }
  0xd1   :  { %2443 = vmatprep.subr.bf16.mxu1 %v3722_v48 }
  0xd3   :  { %2401 = vmatpush1.bf16.msra.mxu0 %v3660_v54  ;;  %v4788_v54 = vshrl.u32 %v246_v13, 7 }
  0xd4   :  { %2402 = vmatprep.subr.bf16.mxu0 %v3665_v23  ;;  %2444 = vmatpush1.bf16.msra.mxu1 %v3720_v47 }
  0xd5   :  { %2445 = vmatprep.subr.bf16.mxu1 %v3728_v52 }
  0xd7   :  { %2403 = vmatpush1.bf16.msra.mxu0 %v3663_v26 }
  0xd8   :  { %2404 = vmatprep.subr.bf16.mxu0 %v3668_v38  ;;  %2446 = vmatpush1.bf16.msra.mxu1 %v3726_v51  ;;  %v252_v38 = vsub.s32 1, %v4788_v54 }
  0xd9   :  { %2447 = vmatprep.subr.bf16.mxu1 %v3734_v57 }
  0xdb   :  { %2405 = vmatpush1.bf16.msra.mxu0 %v3666_v39  ;;  %v248_v39 = vsub.s32 0, %v4788_v54 }
  0xdc   :  { %2406 = vmatprep.subr.bf16.mxu0 %v3671_v41  ;;  %2448 = vmatpush1.bf16.msra.mxu1 %v3732_v56 }
  0xdd   :  { %2449 = vmatprep.subr.bf16.mxu1 %v3740_v61  ;;  %v249_v43 = vrot.slane %v4795_v12, %v248_v39 }
  0xdf   :  { %2407 = vmatpush1.bf16.msra.mxu0 %v3669_v42  ;;  %v253_v42 = vrot.slane %v4795_v12, %v252_v38 }
  0xe0   :  { %2408 = vmatprep.subr.bf16.mxu0 %v3674_v45  ;;  %2450 = vmatpush1.bf16.msra.mxu1 %v3738_v60 }
  0xe1   :  { %2451 = vmatprep.subr.bf16.mxu1 %v3746_v1 }
  0xe3   :  { %2409 = vmatpush1.bf16.msra.mxu0 %v3672_v46 }
  0xe4   :  { %2410 = vmatprep.subr.bf16.mxu0 %v3677_v49  ;;  %2452 = vmatpush1.bf16.msra.mxu1 %v3744_v0 }
  0xe5   :  { %2453 = vmatprep.subr.bf16.mxu1 %v3752_v5 }
  0xe7   :  { %2411 = vmatpush1.bf16.msra.mxu0 %v3675_v50 }
  0xe8   :  { %2412 = vmatprep.subr.bf16.mxu0 %v3680_v53  ;;  %2454 = vmatpush1.bf16.msra.mxu1 %v3750_v4 }
  0xe9   :  { %2455 = vmatprep.subr.bf16.mxu1 %v3758_v9 }
  0xeb   :  { %2413 = vmatpush2.bf16.msra.mxu0 %v3678_v55 }
  0xec   :  { %2414 = vmatprep.subr.bf16.mxu0 %v3683_v58  ;;  %2456 = vmatpush2.bf16.msra.mxu1 %v3756_v8 }
  0xed   :  { %2457 = vmatprep.subr.bf16.mxu1 %v3764_v15 }
  0xef   :  { %2415 = vmatpush2.bf16.msra.mxu0 %v3681_v59 }
  0xf0   :  { %2416 = vmatprep.subr.bf16.mxu0 %v3686_v62  ;;  %2458 = vmatpush2.bf16.msra.mxu1 %v3762_v14  ;;  %v3702_v14 = vld [vmem:[%s5124_s3 + $0xe8] ss:$16 sps:$4 sm:$0xff]  }
  0xf1   :  { %2459 = vmatprep.subr.bf16.mxu1 %v3770_v19  ;;  %v3711_v19 = vld [vmem:[%s5124_s3 + $0xa8] ss:$16 sps:$4 sm:$0xff]  }
  0xf3   :  { %2417 = vmatpush2.bf16.msra.mxu0 %v3684_v63 }
  0xf4   :  { %2418 = vmatprep.subr.bf16.mxu0 %v3689_v2  ;;  %2460 = vmatpush2.bf16.msra.mxu1 %v3768_v18  ;;  %v3713_v18 = vld [vmem:[%s5124_s3 + $0xac] ss:$16 sps:$4 sm:$0xff]  }
  0xf5   :  { %2461 = vmatprep.subr.bf16.mxu1 %v3776_v24  ;;  %v3725_v24 = vld [vmem:[%s5124_s3 + $0x6c] ss:$16 sps:$4 sm:$0xff]  }
  0xf7   :  { %2419 = vmatpush2.bf16.msra.mxu0 %v3687_v3 }
  0xf8   :  { %2420 = vmatprep.subr.bf16.mxu0 %v3692_v6  ;;  %2462 = vmatpush2.bf16.msra.mxu1 %v3774_v27  ;;  %v3731_v27 = vld [vmem:[%s5124_s3 + $0x4c] ss:$16 sps:$4 sm:$0xff]  }
  0xf9   :  { %2463 = vmatprep.subr.bf16.mxu1 %v3782_v28  ;;  %v3729_v28 = vld [vmem:[%s5124_s3 + $0x48] ss:$16 sps:$4 sm:$0xff]  }
  0xfb   :  { %2421 = vmatpush2.bf16.msra.mxu0 %v3690_v7 }
  0xfc   :  { %2422 = vmatprep.subr.bf16.mxu0 %v3695_v10  ;;  %2464 = vmatpush2.bf16.msra.mxu1 %v3780_v29  ;;  %v3737_v29 = vld [vmem:[%s5124_s3 + $0x2c] ss:$16 sps:$4 sm:$0xff]  }
  0xfd   :  { %2465 = vmatprep.subr.bf16.mxu1 %v3788_v30  ;;  %v3735_v30 = vld [vmem:[%s5124_s3 + $0x28] ss:$16 sps:$4 sm:$0xff]  }
  0xff   :  { %2423 = vmatpush2.bf16.msra.mxu0 %v3693_v11 }
 0x100   :  { %2424 = vmatprep.subr.bf16.mxu0 %v3698_v16  ;;  %2466 = vmatpush2.bf16.msra.mxu1 %v3786_v31  ;;  %v3707_v16 = vld [vmem:[%s5124_s3 + $0xcc] ss:$16 sps:$4 sm:$0xff]  }
 0x101   :  { %2467 = vmatprep.subr.bf16.mxu1 %v3794_v32  ;;  %v3743_v31 = vld [vmem:[%s5124_s3 + $0xc] ss:$16 sps:$4 sm:$0xff]   ;;  %v3741_v32 = vld [vmem:[%s5124_s3 + $0x8] ss:$16 sps:$4 sm:$0xff]  }
 0x102   :  { %v1284_v23 = vpop.f32.mrf.mxu0 }
 0x103   :  { %2425 = vmatpush2.bf16.msra.mxu0 %v3696_v17  ;;  %v1327_v37 = vpop.f32.mrf.mxu1  ;;  %v1285_v47 = vadd.f32 %v1284_v23, %v249_v43  ;;  %v3705_v17 = vld [vmem:[%s5124_s3 + $0xc8] ss:$16 sps:$4 sm:$0xff]   ;;  %v3767_v23 = vld [vmem:[%s5124_s3 + $0x18c] ss:$16 sps:$4 sm:$0xff]  }
 0x104   :  { %2426 = vmatprep.subr.bf16.mxu0 %v3701_v20  ;;  %2468 = vmatpush2.bf16.msra.mxu1 %v3792_v33  ;;  %v1286_v40 = vpop.f32.mrf.mxu0  ;;  %v3719_v20 = vld [vmem:[%s5124_s3 + $0x8c] ss:$16 sps:$4 sm:$0xff]  }
 0x105   :  { %2469 = vmatprep.subr.bf16.mxu1 %v3797_v34  ;;  %v1329_v21 = vpop.f32.mrf.mxu1  ;;  %v1287_v46 = vadd.f32 %v1286_v40, %v253_v42  ;;  %v1328_v55 = vadd.f32 %v1327_v37, %v1285_v47  ;;  %v3749_v33 = vld [vmem:[%s5124_s3 + $0x1ec] ss:$16 sps:$4 sm:$0xff]   ;;  %v3747_v34 = vld [vmem:[%s5124_s3 + $0x1e8] ss:$16 sps:$4 sm:$0xff]  }
 0x106   :  { %v1288_v44 = vpop.f32.mrf.mxu0  ;;  %v3761_v37 = vld [vmem:[%s5124_s3 + $0x1ac] ss:$16 sps:$4 sm:$0xff]  }
 0x107   :  { %2427 = vmatpush2.bf16.msra.mxu0 %v3699_v22  ;;  %v1331_v26 = vpop.f32.mrf.mxu1  ;;  %v1289_v49 = vadd.f32 %v1288_v44, %v249_v43  ;;  %v1330_v52 = vadd.f32 %v1329_v21, %v1287_v46  ;;  %v3717_v22 = vld [vmem:[%s5124_s3 + $0x88] ss:$16 sps:$4 sm:$0xff]   ;;  %v3779_v44 = vld [vmem:[%s5124_s3 + $0x14c] ss:$16 sps:$4 sm:$0xff]   ;;  %v256_v46 = vsub.s32 2, %v4788_v54 }
 0x108   :  { %2482 = vmatprep.subr.bf16.mxu0 %v3704_v25  ;;  %2470 = vmatpush2.bf16.msra.mxu1 %v3795_v35  ;;  %v1290_v48 = vpop.f32.mrf.mxu0  ;;  %v3723_v25 = vld [vmem:[%s5124_s3 + $0x68] ss:$16 sps:$4 sm:$0xff]   ;;  %v3755_v35 = vld [vmem:[%s5124_s3 + $0x1cc] ss:$16 sps:$4 sm:$0xff]  }
 0x109   :  { %2525 = vmatprep.subr.bf16.mxu1 %v3800_v36  ;;  %v1333_v41 = vpop.f32.mrf.mxu1  ;;  %v1291_v53 = vadd.f32 %v1290_v48, %v253_v42  ;;  %v1332_v57 = vadd.f32 %v1331_v26, %v1289_v49  ;;  %v3753_v36 = vld [vmem:[%s5124_s3 + $0x1c8] ss:$16 sps:$4 sm:$0xff]  }
 0x10a   :  { %v3759_v21 = vld [vmem:[%s5124_s3 + $0x1a8] ss:$16 sps:$4 sm:$0xff]  }
 0x10b   :  { %v1413_v45 = vpop.f32.mrf.mxu1  ;;  %v1334_v62 = vadd.f32 %v1333_v41, %v1291_v53  ;;  %v3765_v26 = vld [vmem:[%s5124_s3 + $0x188] ss:$16 sps:$4 sm:$0xff]   ;;  %v3773_v41 = vld [vmem:[%s5124_s3 + $0x16c] ss:$16 sps:$4 sm:$0xff]   ;;  %v257_v53 = vrot.slane %v4795_v12, %v256_v46 }
 0x10c   :  { %v3771_v42 = vld [vmem:[%s5124_s3 + $0x168] ss:$16 sps:$4 sm:$0xff]  }
 0x10d   :  { %v1415_v50 = vpop.f32.mrf.mxu1  ;;  %v3777_v48 = vld [vmem:[%s5124_s3 + $0x148] ss:$16 sps:$4 sm:$0xff]  }
 0x10f   :  { %v1417_v59 = vpop.f32.mrf.mxu1 }
 0x111   :  { %v1419_v4 = vpop.f32.mrf.mxu1 }
 0x142   :  { %v1370_v51 = vpop.f32.mrf.mxu0 }
 0x143   :  { %v1371_v60 = vadd.f32 %v1370_v51, %v1328_v55  ;;  %v3785_v51 = vld [vmem:[%s5124_s3 + $0x12c] ss:$16 sps:$4 sm:$0xff]  }
 0x144   :  { %v1372_v56 = vpop.f32.mrf.mxu0 }
 0x145   :  { %v1373_v58 = vadd.f32 %v1372_v56, %v1330_v52  ;;  %v1414_v5 = vadd.f32 %v1413_v45, %v1371_v60  ;;  %v260_v45 = vsub.s32 3, %v4788_v54  ;;  %v3783_v56 = vld [vmem:[%s5124_s3 + $0x128] ss:$16 sps:$4 sm:$0xff]  }
 0x146   :  { %v1374_v61 = vpop.f32.mrf.mxu0 }
 0x147   :  { %v1375_v63 = vadd.f32 %v1374_v61, %v1332_v57  ;;  %v1416_v1 = vadd.f32 %v1415_v50, %v1373_v58  ;;  %v1594_v10 = vmax.f32 %v1414_v5, 0.0  ;;  %v261_v52 = vrot.slane %v4795_v12, %v260_v45  ;;  %v3789_v12 = vld [vmem:[%s5124_s3 + $0x108] ss:$16 sps:$4 sm:$0xff]  }
 0x148   :  { %v1376_v0 = vpop.f32.mrf.mxu0 }
 0x149   :  { %v1418_v2 = vadd.f32 %v1417_v59, %v1375_v63  ;;  %v1377_v3 = vadd.f32 %v1376_v0, %v1334_v62  ;;  %v1595_v8 = vmax.f32 %v1416_v1, 0.0  ;;  %v3791_v59 = vld [vmem:[%s5124_s3 + $0x10c] ss:$16 sps:$4 sm:$0xff]  }
 0x14b   :  { %v1420_v6 = vadd.f32 %v1419_v4, %v1377_v3  ;;  %v1598_v7 = vmax.f32 %v1418_v2, 0.0  ;;  %v1456_v40 = vpop.f32.mrf.mxu1 }
 0x14c   :  { %v1457_v61 = vadd.f32 %v1456_v40, %v257_v53  ;;  %v3850_v40 = vld [vmem:[%s5126_s5 + $0x68] sm:$0xff]  }
 0x14d   :  { %v1599_v9 = vmax.f32 %v1420_v6, 0.0  ;;  %v4806_v15 = vpack.c.bf16 %v1598_v7, %v1594_v10  ;;  %v1458_v43 = vpop.f32.mrf.mxu1 }
 0x14e   :  { %v1459_v60 = vadd.f32 %v1458_v43, %v261_v52  ;;  %v3812_v43 = vld [vmem:[%s5124_s3 + $0x26c] ss:$16 sps:$4 sm:$0xff]  }
 0x14f   :  { %v1603_v11 = vpack.c.bf16 %v1599_v9, %v1595_v8  ;;  %v1460_v49 = vpop.f32.mrf.mxu1 }
 0x150   :  { %v1461_v0 = vadd.f32 %v1460_v49, %v257_v53  ;;  %v3818_v49 = vld [vmem:[%s5124_s3 + $0x22c] ss:$16 sps:$4 sm:$0xff]  }
 0x151   :  { %2428 = vmatprep.mubr.bf16.mxu0 %v1603_v11  ;;  %v1462_v57 = vpop.f32.mrf.mxu1  ;;  %v3824_v53 = vld [vmem:[%s5124_s3 + $0x3ec] ss:$16 sps:$4 sm:$0xff]  }
 0x152   :  { %2429 = vmatmul.mubr.bf16.vlgmr.msra.gmra.mxu0 %v4806_v15  ;;  %v1463_v5 = vadd.f32 %v1462_v57, %v261_v52  ;;  %v3819_v52 = vld [vmem:[%s5124_s3 + $0x208] ss:$16 sps:$4 sm:$0xff]  }
 0x153   :  { %2483 = vmatpush1.bf16.msra.mxu0 %v3702_v14  ;;  %2514 = vmatprep.mubr.bf16.mxu0 %v1603_v11  ;;  %v3825_v57 = vld [vmem:[%s5124_s3 + $0x3c8] ss:$16 sps:$4 sm:$0xff]  }
 0x154   :  { %2484 = vmatprep.subr.bf16.mxu0 %v3707_v16 }
 0x157   :  { %2485 = vmatpush1.bf16.msra.mxu0 %v3705_v17 }
 0x158   :  { %2486 = vmatprep.subr.bf16.mxu0 %v3713_v18 }
 0x15b   :  { %2487 = vmatpush1.bf16.msra.mxu0 %v3711_v19 }
 0x15c   :  { %2488 = vmatprep.subr.bf16.mxu0 %v3719_v20 }
 0x15f   :  { %2489 = vmatpush1.bf16.msra.mxu0 %v3717_v22 }
 0x160   :  { %2490 = vmatprep.subr.bf16.mxu0 %v3725_v24 }
 0x163   :  { %2491 = vmatpush1.bf16.msra.mxu0 %v3723_v25 }
 0x164   :  { %2492 = vmatprep.subr.bf16.mxu0 %v3731_v27 }
 0x167   :  { %2493 = vmatpush1.bf16.msra.mxu0 %v3729_v28 }
 0x168   :  { %2494 = vmatprep.subr.bf16.mxu0 %v3737_v29 }
 0x16b   :  { %2495 = vmatpush1.bf16.msra.mxu0 %v3735_v30 }
 0x16c   :  { %2496 = vmatprep.subr.bf16.mxu0 %v3743_v31  ;;  %v3798_v31 = vld [vmem:[%s5124_s3 + $0x2e8] ss:$16 sps:$4 sm:$0xff]  }
 0x16f   :  { %2497 = vmatpush1.bf16.msra.mxu0 %v3741_v32 }
 0x170   :  { %2498 = vmatprep.subr.bf16.mxu0 %v3749_v33  ;;  %v3803_v33 = vld [vmem:[%s5124_s3 + $0x2cc] ss:$16 sps:$4 sm:$0xff]  }
 0x173   :  { %2499 = vmatpush2.bf16.msra.mxu0 %v3747_v34  ;;  %v3806_v34 = vld [vmem:[%s5124_s3 + $0x2ac] ss:$16 sps:$4 sm:$0xff]  }
 0x174   :  { %2500 = vmatprep.subr.bf16.mxu0 %v3755_v35  ;;  %v3846_v35 = vld [vmem:[%s5126_s5 + $0x78] sm:$0xff]  }
 0x177   :  { %2501 = vmatpush2.bf16.msra.mxu0 %v3753_v36  ;;  %v3847_v36 = vld [vmem:[%s5126_s5 + $0x38] sm:$0xff]  }
 0x178   :  { %2502 = vmatprep.subr.bf16.mxu0 %v3761_v37  ;;  %v3848_v37 = vld [vmem:[%s5126_s5 + $0x70] sm:$0xff]  }
 0x17b   :  { %2503 = vmatpush2.bf16.msra.mxu0 %v3759_v21  ;;  %v3804_v21 = vld [vmem:[%s5124_s3 + $0x2a8] ss:$16 sps:$4 sm:$0xff]  }
 0x17c   :  { %2504 = vmatprep.subr.bf16.mxu0 %v3767_v23  ;;  %v3849_v23 = vld [vmem:[%s5126_s5 + $0x30] sm:$0xff]  }
 0x17f   :  { %2505 = vmatpush2.bf16.msra.mxu0 %v3765_v26  ;;  %v3809_v26 = vld [vmem:[%s5124_s3 + $0x28c] ss:$16 sps:$4 sm:$0xff]  }
 0x180   :  { %2506 = vmatprep.subr.bf16.mxu0 %v3773_v41  ;;  %v3851_v41 = vld [vmem:[%s5126_s5 + $0x28] sm:$0xff]  }
 0x182   :  { %v1499_v47 = vpop.f32.mrf.mxu0 }
 0x183   :  { %2507 = vmatpush2.bf16.msra.mxu0 %v3771_v42  ;;  %v1500_v2 = vadd.f32 %v1499_v47, %v1457_v61  ;;  %v3807_v42 = vld [vmem:[%s5124_s3 + $0x288] ss:$16 sps:$4 sm:$0xff]   ;;  %v3815_v47 = vld [vmem:[%s5124_s3 + $0x24c] ss:$16 sps:$4 sm:$0xff]  }
 0x184   :  { %v1501_v50 = vpop.f32.mrf.mxu0  ;;  %2508 = vmatprep.subr.bf16.mxu0 %v3779_v44  ;;  %v3810_v44 = vld [vmem:[%s5124_s3 + $0x268] ss:$16 sps:$4 sm:$0xff]  }
 0x185   :  { %v1502_v1 = vadd.f32 %v1501_v50, %v1459_v60  ;;  %v3816_v50 = vld [vmem:[%s5124_s3 + $0x228] ss:$16 sps:$4 sm:$0xff]   ;;  %v3833_v60 = vld [vmem:[%s5124_s3 + $0x38c] ss:$16 sps:$4 sm:$0xff]  }
 0x186   :  { %v1503_v55 = vpop.f32.mrf.mxu0  ;;  %v3831_v61 = vld [vmem:[%s5124_s3 + $0x388] ss:$16 sps:$4 sm:$0xff]  }
 0x187   :  { %2509 = vmatpush2.bf16.msra.mxu0 %v3777_v48  ;;  %v1504_v6 = vadd.f32 %v1503_v55, %v1461_v0  ;;  %v3813_v48 = vld [vmem:[%s5124_s3 + $0x248] ss:$16 sps:$4 sm:$0xff]   ;;  %v3839_v0 = vld [vmem:[%s5124_s3 + $0x34c] ss:$16 sps:$4 sm:$0xff]  }
 0x188   :  { %v1505_v58 = vpop.f32.mrf.mxu0  ;;  %2510 = vmatprep.subr.bf16.mxu0 %v3785_v51  ;;  %v3821_v51 = vld [vmem:[%s5124_s3 + $0x20c] ss:$16 sps:$4 sm:$0xff]   ;;  %v3822_v55 = vld [vmem:[%s5124_s3 + $0x3e8] ss:$16 sps:$4 sm:$0xff]  }
 0x189   :  { %v1506_v11 = vadd.f32 %v1505_v58, %v1463_v5  ;;  %v3830_v58 = vld [vmem:[%s5124_s3 + $0x3ac] ss:$16 sps:$4 sm:$0xff]   ;;  %v3852_v5 = vld [vmem:[%s5126_s5 + $0x60] sm:$0xff]  }
 0x18a   :  { %v1585_v63 = vpop.f32.mrf.mxu0 }
 0x18b   :  { %v1542_v62 = vpop.f32.mrf.mxu1  ;;  %2511 = vmatpush2.bf16.msra.mxu0 %v3783_v56  ;;  %v3827_v56 = vld [vmem:[%s5124_s3 + $0x3cc] ss:$16 sps:$4 sm:$0xff]  }
 0x18c   :  { %v1587_v4 = vpop.f32.mrf.mxu0  ;;  %2512 = vmatprep.subr.bf16.mxu0 %v3791_v59  ;;  %v1543_v8 = vadd.f32 %v1542_v62, %v1500_v2  ;;  %v3828_v59 = vld [vmem:[%s5124_s3 + $0x3a8] ss:$16 sps:$4 sm:$0xff]   ;;  %v3836_v62 = vld [vmem:[%s5124_s3 + $0x36c] ss:$16 sps:$4 sm:$0xff]  }
 0x18d   :  { %v1544_v3 = vpop.f32.mrf.mxu1  ;;  %v3840_v2 = vld [vmem:[%s5124_s3 + $0x328] ss:$16 sps:$4 sm:$0xff]  }
 0x18e   :  { %v1545_v7 = vadd.f32 %v1544_v3, %v1502_v1  ;;  %v1589_v10 = vpop.f32.mrf.mxu0  ;;  %v1586_v22 = vadd.f32 %v1585_v63, %v1543_v8  ;;  %v3834_v63 = vld [vmem:[%s5124_s3 + $0x368] ss:$16 sps:$4 sm:$0xff]   ;;  %v3845_v3 = vld [vmem:[%s5124_s3 + $0x30c] ss:$16 sps:$4 sm:$0xff]  }
 0x18f   :  { %v1546_v9 = vpop.f32.mrf.mxu1  ;;  %2513 = vmatpush2.bf16.msra.mxu0 %v3789_v12  ;;  %v3837_v1 = vld [vmem:[%s5124_s3 + $0x348] ss:$16 sps:$4 sm:$0xff]   ;;  %v3842_v12 = vld [vmem:[%s5124_s3 + $0x32c] ss:$16 sps:$4 sm:$0xff]  }
 0x190   :  { %v1547_v14 = vadd.f32 %v1546_v9, %v1504_v6  ;;  %v1591_v17 = vpop.f32.mrf.mxu0  ;;  %v1588_v18 = vadd.f32 %v1587_v4, %v1545_v7  ;;  %v1596_v29 = vmax.f32 %v1586_v22, 0.0  ;;  %3315 = vmatprep.subr.bf16.mxu0 %v3846_v35  ;;  %v3843_v4 = vld [vmem:[%s5124_s3 + $0x308] ss:$16 sps:$4 sm:$0xff]   ;;  %v3853_v6 = vld [vmem:[%s5126_s5 + $0x20] sm:$0xff]   ;;  %v3856_v9 = vld [vmem:[%s5126_s5 + $0x50] sm:$0xff]  }
 0x191   :  { %v1548_v16 = vpop.f32.mrf.mxu1  ;;  %v3854_v7 = vld [vmem:[%s5126_s5 + $0x58] sm:$0xff]   ;;  %v3865_v22 = vld [vmem:[%s5126_s5 + $0xb0] sm:$0xff]   ;;  %v3877_v35 = vld [vmem:[%s5126_s5 + $0x80] sm:$0xff]  }
 0x192   :  { %v1590_v19 = vadd.f32 %v1589_v10, %v1547_v14  ;;  %v1549_v20 = vadd.f32 %v1548_v16, %v1506_v11  ;;  %2515 = vmatmul.mubr.bf16.vlgmr.msra.gmra.mxu0 %v4806_v15  ;;  %v1597_v27 = vmax.f32 %v1588_v18, 0.0  ;;  %v3801_v15 = vld [vmem:[%s5124_s3 + $0x2c8] ss:$16 sps:$4 sm:$0xff]   ;;  %v3857_v10 = vld [vmem:[%s5126_s5 + $0x10] sm:$0xff]   ;;  %v3860_v16 = vld [vmem:[%s5126_s5 + $0x40] sm:$0xff]  }
 0x193   :  { %3316 = vmatpush3.bf16.msra.mxu0 %v3847_v36  ;;  %v3855_v8 = vld [vmem:[%s5126_s5 + $0x18] sm:$0xff]   ;;  %v3858_v11 = vld [vmem:[%s5126_s5 + $0x48] sm:$0xff]  }
 0x194   :  { %v1592_v24 = vadd.f32 %v1591_v17, %v1549_v20  ;;  %v1600_v25 = vmax.f32 %v1590_v19, 0.0  ;;  %3317 = vmatprep.subr.bf16.mxu0 %v3848_v37  ;;  %v3859_v14 = vld [vmem:[%s5126_s5 + $0x8] sm:$0xff]   ;;  %v3861_v17 = vld [vmem:[%s5126_s5] sm:$0xff]   ;;  %v3862_v18 = vld [vmem:[%s5126_s5 + $0xf8] sm:$0xff]  }
 0x195   :  { %v3863_v19 = vld [vmem:[%s5126_s5 + $0xb8] sm:$0xff]   ;;  %v3864_v20 = vld [vmem:[%s5126_s5 + $0xf0] sm:$0xff]  }
 0x196   :  { %v1601_v28 = vmax.f32 %v1592_v24, 0.0  ;;  %v4911_v32 = vpack.c.bf16 %v1600_v25, %v1596_v29  ;;  %v3866_v24 = vld [vmem:[%s5126_s5 + $0xe8] sm:$0xff]   ;;  %v3870_v29 = vld [vmem:[%s5126_s5 + $0xd8] sm:$0xff]  }
 0x197   :  { %3318 = vmatpush3.bf16.msra.mxu0 %v3849_v23  ;;  %v3867_v25 = vld [vmem:[%s5126_s5 + $0xa8] sm:$0xff]  }
 0x198   :  { %v1605_v30 = vpack.c.bf16 %v1601_v28, %v1597_v27  ;;  %3319 = vmatprep.subr.bf16.mxu0 %v3850_v40  ;;  %v3868_v27 = vld [vmem:[%s5126_s5 + $0xe0] sm:$0xff]  }
 0x199   :  { %v3869_v28 = vld [vmem:[%s5126_s5 + $0xa0] sm:$0xff]  }
 0x19a   :  { %2471 = vmatprep.mubr.bf16.mxu1 %v1605_v30 }
 0x19b   :  { %2472 = vmatmul.mubr.bf16.vlgmr.msra.gmra.mxu1 %v4911_v32  ;;  %3320 = vmatpush3.bf16.msra.mxu0 %v3851_v41 }
 0x19c   :  { %2526 = vmatpush1.bf16.msra.mxu1 %v3798_v31  ;;  %2557 = vmatprep.mubr.bf16.mxu1 %v1605_v30  ;;  %v3871_v30 = vld [vmem:[%s5126_s5 + $0x98] sm:$0xff]   ;;  %v3872_v31 = vld [vmem:[%s5126_s5 + $0xd0] sm:$0xff]  }
 0x19d   :  { %2527 = vmatprep.subr.bf16.mxu1 %v3803_v33  ;;  %3321 = vmatprep.subr.bf16.mxu0 %v3852_v5  ;;  %v3874_v33 = vld [vmem:[%s5126_s5 + $0xc8] sm:$0xff]  }
 0x19f   :  { %3322 = vmatpush3.bf16.msra.mxu0 %v3853_v6 }
 0x1a0   :  { %2528 = vmatpush1.bf16.msra.mxu1 %v3801_v15  ;;  %3323 = vmatprep.subr.bf16.mxu0 %v3854_v7  ;;  %v3875_v15 = vld [vmem:[%s5126_s5 + $0x88] sm:$0xff]  }
 0x1a1   :  { %2529 = vmatprep.subr.bf16.mxu1 %v3806_v34  ;;  %v3876_v34 = vld [vmem:[%s5126_s5 + $0xc0] sm:$0xff]  }
 0x1a3   :  { %3324 = vmatpush3.bf16.msra.mxu0 %v3855_v8 }
 0x1a4   :  { %2530 = vmatpush1.bf16.msra.mxu1 %v3804_v21  ;;  %3325 = vmatprep.subr.bf16.mxu0 %v3856_v9  ;;  %v1734_v21 = vld [vmem:[%s5127_s4] sm:$0xf] }
 0x1a5   :  { %2531 = vmatprep.subr.bf16.mxu1 %v3809_v26  ;;  %v1743_v26 = vrot.slane %v1734_v21, %v252_v38  ;;  %v1739_v40 = vrot.slane %v1734_v21, %v248_v39 }
 0x1a7   :  { %3326 = vmatpush3.bf16.msra.mxu0 %v3857_v10 }
 0x1a8   :  { %2532 = vmatpush1.bf16.msra.mxu1 %v3807_v42  ;;  %3327 = vmatprep.subr.bf16.mxu0 %v3858_v11 }
 0x1a9   :  { %2533 = vmatprep.subr.bf16.mxu1 %v3812_v43 }
 0x1ab   :  { %3328 = vmatpush3.bf16.msra.mxu0 %v3859_v14 }
 0x1ac   :  { %2534 = vmatpush1.bf16.msra.mxu1 %v3810_v44  ;;  %3329 = vmatprep.subr.bf16.mxu0 %v3860_v16 }
 0x1ad   :  { %2535 = vmatprep.subr.bf16.mxu1 %v3815_v47 }
 0x1af   :  { %3330 = vmatpush3.bf16.msra.mxu0 %v3861_v17 }
 0x1b0   :  { %2536 = vmatpush1.bf16.msra.mxu1 %v3813_v48 }
 0x1b1   :  { %2537 = vmatprep.subr.bf16.mxu1 %v3818_v49 }
 0x1b4   :  { %2538 = vmatpush1.bf16.msra.mxu1 %v3816_v50 }
 0x1b5   :  { %2539 = vmatprep.subr.bf16.mxu1 %v3821_v51 }
 0x1b8   :  { %2540 = vmatpush1.bf16.msra.mxu1 %v3819_v52 }
 0x1b9   :  { %2541 = vmatprep.subr.bf16.mxu1 %v3824_v53 }
 0x1bc   :  { %2542 = vmatpush2.bf16.msra.mxu1 %v3822_v55 }
 0x1bd   :  { %2543 = vmatprep.subr.bf16.mxu1 %v3827_v56 }
 0x1c0   :  { %2544 = vmatpush2.bf16.msra.mxu1 %v3825_v57 }
 0x1c1   :  { %2545 = vmatprep.subr.bf16.mxu1 %v3830_v58 }
 0x1c4   :  { %2546 = vmatpush2.bf16.msra.mxu1 %v3828_v59 }
 0x1c5   :  { %2547 = vmatprep.subr.bf16.mxu1 %v3833_v60 }
 0x1c8   :  { %2548 = vmatpush2.bf16.msra.mxu1 %v3831_v61 }
 0x1c9   :  { %2549 = vmatprep.subr.bf16.mxu1 %v3836_v62 }
 0x1cc   :  { %2550 = vmatpush2.bf16.msra.mxu1 %v3834_v63 }
 0x1cd   :  { %2551 = vmatprep.subr.bf16.mxu1 %v3839_v0  ;;  %v1751_v0 = vrot.slane %v1734_v21, %v260_v45 }
 0x1d0   :  { %2552 = vmatpush2.bf16.msra.mxu1 %v3837_v1  ;;  %v1747_v1 = vrot.slane %v1734_v21, %v256_v46 }
 0x1d1   :  { %2553 = vmatprep.subr.bf16.mxu1 %v3842_v12 }
 0x1d4   :  { %2554 = vmatpush2.bf16.msra.mxu1 %v3840_v2 }
 0x1d5   :  { %2555 = vmatprep.subr.bf16.mxu1 %v3845_v3 }
 0x1d8   :  { %2556 = vmatpush2.bf16.msra.mxu1 %v3843_v4 }
 0x1d9   :  { %3337 = vmatprep.subr.bf16.mxu1 %v3862_v18 }
 0x1db   :  { %2558 = vmatmul.mubr.bf16.vlgmr.msra.gmra.mxu1 %v4911_v32  ;;  %v3873_v32 = vld [vmem:[%s5126_s5 + $0x90] sm:$0xff]  }
 0x1dc   :  { %3338 = vmatpush3.bf16.msra.mxu1 %v3863_v19 }
 0x1dd   :  { %3339 = vmatprep.subr.bf16.mxu1 %v3864_v20 }
 0x1e0   :  { %3340 = vmatpush3.bf16.msra.mxu1 %v3865_v22 }
 0x1e1   :  { %3341 = vmatprep.subr.bf16.mxu1 %v3866_v24 }
 0x1e4   :  { %3342 = vmatpush3.bf16.msra.mxu1 %v3867_v25 }
 0x1e5   :  { %3343 = vmatprep.subr.bf16.mxu1 %v3868_v27  ;;  %v3282_v27 = vld [vmem:[%s5128_s6] ss:$0 sm:$0xff] }
 0x1e8   :  { %3344 = vmatpush3.bf16.msra.mxu1 %v3869_v28 }
 0x1e9   :  { %3345 = vmatprep.subr.bf16.mxu1 %v3870_v29 }
 0x1ec   :  { %3346 = vmatpush3.bf16.msra.mxu1 %v3871_v30 }
 0x1ed   :  { %3347 = vmatprep.subr.bf16.mxu1 %v3872_v31  ;;  %v2928_v31 = vand.u32 127, %v246_v13 }
 0x1ef   :  { %vm2929_vm1 = vcmp.lt.s32.totalorder %v2928_v31, 10 }
 0x1f0   :  { %3348 = vmatpush3.bf16.msra.mxu1 %v3873_v32 }
 0x1f1   :  { %3349 = vmatprep.subr.bf16.mxu1 %v3874_v33 }
 0x1f4   :  { %3350 = vmatpush3.bf16.msra.mxu1 %v3875_v15 }
 0x1f5   :  { %3351 = vmatprep.subr.bf16.mxu1 %v3876_v34 }
 0x1f8   :  { %3352 = vmatpush3.bf16.msra.mxu1 %v3877_v35 }
 0x212   :  { %v2430_v36 = vpop.f32.mrf.mxu0 }
 0x213   :  { %v2431_v48 = vadd.f32 %v2430_v36, %v1739_v40 }
 0x214   :  { %v2432_v37 = vpop.f32.mrf.mxu0 }
 0x215   :  { %v2433_v44 = vadd.f32 %v2432_v37, %v1743_v26 }
 0x216   :  { %v2434_v23 = vpop.f32.mrf.mxu0 }
 0x217   :  { %v2435_v47 = vadd.f32 %v2434_v23, %v1739_v40 }
 0x218   :  { %v2436_v42 = vpop.f32.mrf.mxu0 }
 0x219   :  { %v2437_v50 = vadd.f32 %v2436_v42, %v1743_v26 }
 0x252   :  { %v2516_v39 = vpop.f32.mrf.mxu0 }
 0x253   :  { %v2517_v6 = vadd.f32 %v2516_v39, %v1747_v1 }
 0x254   :  { %v2518_v62 = vpop.f32.mrf.mxu0 }
 0x255   :  { %v2519_v4 = vadd.f32 %v2518_v62, %v1751_v0 }
 0x256   :  { %v2520_v63 = vpop.f32.mrf.mxu0 }
 0x257   :  { %v2521_v5 = vadd.f32 %v2520_v63, %v1747_v1 }
 0x258   :  { %v2522_v2 = vpop.f32.mrf.mxu0 }
 0x259   :  { %v2523_v8 = vadd.f32 %v2522_v2, %v1751_v0 }
 0x25b   :  { %v2473_v41 = vpop.f32.mrf.mxu1 }
 0x25c   :  { %v2474_v53 = vadd.f32 %v2473_v41, %v2431_v48 }
 0x25d   :  { %v2475_v43 = vpop.f32.mrf.mxu1 }
 0x25e   :  { %v2476_v51 = vadd.f32 %v2475_v43, %v2433_v44  ;;  %v2568_v38 = vmax.f32 %v2474_v53, 0.0 }
 0x25f   :  { %v2477_v49 = vpop.f32.mrf.mxu1 }
 0x260   :  { %v2478_v52 = vadd.f32 %v2477_v49, %v2435_v47  ;;  %v2569_v58 = vmax.f32 %v2476_v51, 0.0 }
 0x261   :  { %v2479_v55 = vpop.f32.mrf.mxu1 }
 0x262   :  { %v2480_v56 = vadd.f32 %v2479_v55, %v2437_v50  ;;  %v2572_v57 = vmax.f32 %v2478_v52, 0.0 }
 0x264   :  { %v2573_v59 = vmax.f32 %v2480_v56, 0.0  ;;  %v2576_v61 = vpack.c.bf16 %v2572_v57, %v2568_v38 }
 0x266   :  { %v2577_v60 = vpack.c.bf16 %v2573_v59, %v2569_v58 }
 0x268   :  { %2875 = vmatprep.mubr.bf16.mxu0 %v2577_v60 }
 0x269   :  { %2876 = vmatmul.mubr.bf16.vlgmr.msra.gmra.mxu0 %v2576_v61 }
 0x29b   :  { %v2559_v12 = vpop.f32.mrf.mxu1 }
 0x29c   :  { %v2560_v11 = vadd.f32 %v2559_v12, %v2517_v6 }
 0x29d   :  { %v2561_v3 = vpop.f32.mrf.mxu1 }
 0x29e   :  { %v2562_v9 = vadd.f32 %v2561_v3, %v2519_v4  ;;  %v2570_v45 = vmax.f32 %v2560_v11, 0.0 }
 0x29f   :  { %v2563_v7 = vpop.f32.mrf.mxu1 }
 0x2a0   :  { %v2564_v10 = vadd.f32 %v2563_v7, %v2521_v5  ;;  %v2571_v18 = vmax.f32 %v2562_v9, 0.0 }
 0x2a1   :  { %v2565_v14 = vpop.f32.mrf.mxu1 }
 0x2a2   :  { %v2566_v16 = vadd.f32 %v2565_v14, %v2523_v8  ;;  %v2574_v17 = vmax.f32 %v2564_v10, 0.0 }
 0x2a4   :  { %v2575_v19 = vmax.f32 %v2566_v16, 0.0  ;;  %v2578_v54 = vpack.c.bf16 %v2574_v17, %v2570_v45 }
 0x2a6   :  { %v2579_v20 = vpack.c.bf16 %v2575_v19, %v2571_v18 }
 0x2a8   :  { %2916 = vmatprep.mubr.bf16.mxu1 %v2579_v20 }
 0x2a9   :  { %2917 = vmatmul.mubr.bf16.vlgmr.msra.gmra.mxu1 %v2578_v54 }
 0x329   :  { %v3331_v46 = vpop.f32.mrf.mxu0 }
 0x32b   :  { %v3332_v22 = vpop.f32.mrf.mxu0 }
 0x32c   :  { %v3333_v25 = vadd.f32 %v3332_v22, %v3331_v46 }
 0x32d   :  { %v3334_v24 = vpop.f32.mrf.mxu0 }
 0x32e   :  { %v2878_v32 = vadd.f32 %v3333_v25, %v3282_v27 }
 0x32f   :  { %v3335_v28 = vpop.f32.mrf.mxu0 }
 0x330   :  { %v3336_v33 = vadd.f32 %v3335_v28, %v3334_v24 }
 0x332   :  { %v2881_v37 = vadd.f32 %v3336_v33, %v3282_v27 }
 0x369   :  { %v3353_v29 = vpop.f32.mrf.mxu1 }
 0x36b   :  { %v3354_v30 = vpop.f32.mrf.mxu1 }
 0x36c   :  { %v3355_v15 = vadd.f32 %v3354_v30, %v3353_v29 }
 0x36d   :  { %v3356_v34 = vpop.f32.mrf.mxu1 }
 0x36e   :  { %v2919_v35 = vadd.f32 %v3355_v15, %v2878_v32 }
 0x36f   :  { %v3357_v36 = vpop.f32.mrf.mxu1 }
 0x370   :  { %v3358_v21 = vadd.f32 %v3357_v36, %v3356_v34  ;;  %v2925_v23 = vmax.f32 %v2919_v35, 0.0 }
 0x372   :  { %v2922_v26 = vadd.f32 %v3358_v21, %v2881_v37  ;;  %v2930_v40 = vsel %vm2929_vm1, %v2925_v23, -inf }
 0x373   :  { %2932 = vmax.xlane.f32.xlu0 %v2930_v40 }
 0x374   :  { %v2926_v41 = vmax.f32 %v2922_v26, 0.0 }
 0x376   :  { %v2931_v42 = vsel %vm2929_vm1, %v2926_v41, -inf }
 0x377   :  { %2934 = vmax.xlane.f32.xlu0 %v2931_v42 }
 0x3fc   :  { %v2933_v43 = vpop.xlane.xlu0 %2932 }
 0x3fd   :  { %v2936_v44 = vsub.f32 %v2930_v40, %v2933_v43 }
 0x3ff   :  { %v2938_v47 = vmul.f32 1.442695, %v2936_v44 }
 0x400   :  { %v2935_v13 = vpop.xlane.xlu0 %2934 }
 0x401   :  { %3878 = vpow2.f32 %v2938_v47  ;;  %v2937_v48 = vsub.f32 %v2931_v42, %v2935_v13 }
 0x403   :  { %v2940_v49 = vmul.f32 1.442695, %v2937_v48 }
 0x405   :  { %3880 = vpow2.f32 %v2940_v49 }
 0x40e   :  { %v3879_v50 = vpop.eup %3878 }
 0x40f   :  { %2942 = vadd.xlane.f32.xlu1 %v3879_v50 }
 0x412   :  { %v3881_v51 = vpop.eup %3880 }
 0x413   :  { %2944 = vadd.xlane.f32.xlu1 %v3881_v51 }
 0x498   :  { %v2943_v52 = vpop.xlane.xlu1 %2942 }
 0x499   :  { %3882 = vrcp.f32 %v2943_v52 }
 0x49c   :  { %v2945_v53 = vpop.xlane.xlu1 %2944 }
 0x49d   :  { %3884 = vrcp.f32 %v2945_v53 }
 0x4a6   :  { %v3883_v55 = vpop.eup %3882 }
 0x4a7   :  { %v2948_v56 = vmul.f32 %v3883_v55, %v3879_v50 }
 0x4a9   :  { %2950 = vst [vmem:[%s5129_s7] sm:$0xff] %v2948_v56 }
 0x4aa   :  { %v3885_v57 = vpop.eup %3884 }
 0x4ab   :  { %v2949_v58 = vmul.f32 %v3885_v57, %v3881_v51 }
 0x4ad   :  { %2951 = vst [vmem:[%s5129_s7 + $0x8] sm:$0xff] %v2949_v58 }

</bundles_post_ra>
